<compile_context>
chip_gen: v5e
topology: v5e:2x2
jax: 0.10.0
libtpu: 0.0.40
codegen_flags: <defaults>
</compile_context>

<pallas_src>
import functools

import jax
import jax.numpy as jnp
from jax.experimental import pallas as pl
from jax.experimental.pallas import tpu as pltpu


def _ctx_attn_kernel(ctx_ref, doc_ref,
                     wqT_ref, bq_ref, wkvT_ref, bkv_ref, woT_ref, bo_ref,
                     out_ref, *, head_count, sent_len):
    """One grid step = one attention block (pre/pos) x one tile of query rows.

    ctx_ref : (1, Tm*L, D) bf16  keys/values source; query row r of the tile
                                 owns context rows [r*L, (r+1)*L)
    doc_ref : (Tm, D)      f32   queries for this row tile (shared pre/pos)
    wqT_ref : (1, D, D)    bf16  pre-transposed nn.Linear weight (y = x@W.T+b)
    bq_ref  : (1, 1, D)    f32
    wkvT_ref: (1, D, 2D)   bf16  fused [Wk.T | Wv.T]
    bkv_ref : (1, 1, 2D)   f32   fused [bk | bv]
    woT_ref : (1, D, D)    bf16
    bo_ref  : (1, 1, D)    f32
    out_ref : (1, Tm, D)
    """
    tm, d = doc_ref.shape
    L = sent_len
    dh = d // head_count
    scale = 1.0 / (dh ** 0.5)

    ctx = ctx_ref[0]                                          # (Tm*L, D) bf16

    # Fused K|V projection: one (Tm*L, D) @ (D, 2D) MXU matmul, f32 accumulate.
    kv = jnp.dot(ctx, wkvT_ref[0],
                 preferred_element_type=jnp.float32) + bkv_ref[0]
    kv = kv.astype(jnp.bfloat16)
    k = kv[:, :d].reshape(tm, L, d)                           # (Tm, L, D)
    v = kv[:, d:].reshape(tm, L, d)

    # Query projection; scale once by 1/sqrt(dh) instead of per-head scaling.
    q = jnp.dot(doc_ref[...].astype(jnp.bfloat16), wqT_ref[0],
                preferred_element_type=jnp.float32) + bq_ref[0]
    q = (q * scale).astype(jnp.bfloat16)                      # (Tm, D)

    # Per-row attention over that row's own L keys: no block-diagonal score
    # matrix, no mask.  Heads unrolled at trace time (H is small); each head
    # is two batched (batch = Tm) MXU einsums; softmax in f32 on VPU/EUP.
    head_outs = []
    for h in range(head_count):
        sl = slice(h * dh, (h + 1) * dh)
        qh = q[:, sl].reshape(tm, 1, dh)                      # (Tm, 1, dh)
        kh = k[:, :, sl]                                      # (Tm, L, dh)
        vh = v[:, :, sl]                                      # (Tm, L, dh)

        s = jnp.einsum('rqd,rkd->rqk', qh, kh,
                       preferred_element_type=jnp.float32)    # (Tm, 1, L)
        m = jnp.max(s, axis=-1, keepdims=True)
        e = jnp.exp(s - m)
        denom = jnp.sum(e, axis=-1, keepdims=True)
        attn = e * pl.reciprocal(denom, approx=True)          # EUP reciprocal

        o = jnp.einsum('rqk,rkd->rqd', attn.astype(jnp.bfloat16), vh,
                       preferred_element_type=jnp.float32)    # (Tm, 1, dh)
        head_outs.append(o.reshape(tm, dh))

    # Head outputs stay in registers; single (Tm, D) @ (D, D) output
    # projection (no VMEM staging scratch, no 8-lane masked stores).
    concat = jnp.concatenate(head_outs, axis=-1).astype(jnp.bfloat16)
    out = jnp.dot(concat, woT_ref[0],
                  preferred_element_type=jnp.float32) + bo_ref[0]
    out_ref[0] = out.astype(out_ref.dtype)


def context_sent_attention(doc_sents_h, context_pre_h, context_pos_h,
                           pre_params, pos_params, head_count, tile_rows=8):
    """Forward pass of Context_Sent_Attention (both blocks in one kernel)."""
    B, L, _, D = context_pre_h.shape
    assert D % head_count == 0, "model_dim must be divisible by head_count"
    rows = B * L
    tile_rows = min(tile_rows, rows)
    assert rows % tile_rows == 0, "B*max_len must be divisible by tile_rows"
    n_tiles = rows // tile_rows

    # Stack pre/pos along a leading axis of size 2; big MXU/DMA operands bf16.
    ctx_all = (jnp.stack([context_pre_h, context_pos_h])
               .reshape(2, rows * L, D).astype(jnp.bfloat16))
    doc_flat = doc_sents_h.reshape(rows, D)

    def stack_wT(i):      # pre-transposed weights (y = x @ W.T + b), bf16
        return jnp.stack([pre_params[i].T, pos_params[i].T]).astype(jnp.bfloat16)

    def stack_b(i):       # biases stay f32 (added after f32-accumulated dots)
        return jnp.stack([pre_params[i], pos_params[i]])

    wqT, bq = stack_wT(0), stack_b(1)
    # Fused K|V projection weight (D, 2D) and bias (1, 2D).
    wkvT = jnp.stack([
        jnp.concatenate([pre_params[2].T, pre_params[4].T], axis=1),
        jnp.concatenate([pos_params[2].T, pos_params[4].T], axis=1),
    ]).astype(jnp.bfloat16)
    bkv = jnp.stack([
        jnp.concatenate([pre_params[3], pre_params[5]], axis=1),
        jnp.concatenate([pos_params[3], pos_params[5]], axis=1),
    ])
    woT, bo = stack_wT(6), stack_b(7)

    param_idx = lambda g, i: (g, 0, 0)   # weights only change with the block
    kernel = functools.partial(_ctx_attn_kernel,
                               head_count=head_count, sent_len=L)
    out = pl.pallas_call(
        kernel,
        out_shape=jax.ShapeDtypeStruct((2, rows, D), doc_sents_h.dtype),
        grid=(2, n_tiles),
        in_specs=[
            pl.BlockSpec((1, tile_rows * L, D), lambda g, i: (g, i, 0)),   # ctx
            pl.BlockSpec((tile_rows, D),        lambda g, i: (i, 0)),      # doc
            pl.BlockSpec((1, D, D),     param_idx),                        # WqT
            pl.BlockSpec((1, 1, D),     param_idx),                        # bq
            pl.BlockSpec((1, D, 2 * D), param_idx),                        # WkvT
            pl.BlockSpec((1, 1, 2 * D), param_idx),                        # bkv
            pl.BlockSpec((1, D, D),     param_idx),                        # WoT
            pl.BlockSpec((1, 1, D),     param_idx),                        # bo
        ],
        out_specs=pl.BlockSpec((1, tile_rows, D), lambda g, i: (g, i, 0)),
        compiler_params=pltpu.CompilerParams(
            dimension_semantics=("parallel", "parallel")),
    )(ctx_all, doc_flat, wqT, bq, wkvT, bkv, woT, bo)

    context_pre = out[0].reshape(B, L, D)
    context_pos = out[1].reshape(B, L, D)
    return context_pre, context_pos


# ----------------------------------------------------------------------------
# Pure-JAX reference (same math, f32) for the correctness check.
def _mha_ref(context_h, doc, params, head_count):
    B, L, _, D = context_h.shape
    dh = D // head_count
    wq, bq, wk, bk, wv, bv, wo, bo = params
    q = doc @ wq.T + bq[0]                                    # (B, L, D)
    k = context_h @ wk.T + bk[0]                              # (B, L, L, D)
    v = context_h @ wv.T + bv[0]
    qh = q.reshape(B, L, head_count, dh)
    kh = k.reshape(B, L, L, head_count, dh)
    vh = v.reshape(B, L, L, head_count, dh)
    s = jnp.einsum('bihd,bijhd->bihj', qh, kh) / (dh ** 0.5)
    a = jax.nn.softmax(s, axis=-1)
    o = jnp.einsum('bihj,bijhd->bihd', a, vh).reshape(B, L, D)
    return o @ wo.T + bo[0]


def _init_linear(key, d):
    kw, kb = jax.random.split(key)
    bound = 1.0 / (d ** 0.5)
    w = jax.random.uniform(kw, (d, d), jnp.float32, -bound, bound)
    b = jax.random.uniform(kb, (1, d), jnp.float32, -bound, bound)
    return w, b


def _init_mha_params(key, d):
    ks = jax.random.split(key, 4)
    wq, bq = _init_linear(ks[0], d)
    wk, bk = _init_linear(ks[1], d)
    wv, bv = _init_linear(ks[2], d)
    wo, bo = _init_linear(ks[3], d)
    return (wq, bq, wk, bk, wv, bv, wo, bo)


if __name__ == "__main__":
    # configs: head_count=4, model_dim=32; batch=2, max_len=8 (small shapes).
    B, L, D, H = 2, 8, 32, 4

    key = jax.random.PRNGKey(0)
    k_doc, k_pre, k_pos, k_p1, k_p2 = jax.random.split(key, 5)
    doc_sents_h   = jax.random.normal(k_doc, (B, L, D), jnp.float32)
    context_pre_h = jax.random.normal(k_pre, (B, L, L, D), jnp.float32)
    context_pos_h = jax.random.normal(k_pos, (B, L, L, D), jnp.float32)

    pre_params = _init_mha_params(k_p1, D)
    pos_params = _init_mha_params(k_p2, D)

    ctx_pre, ctx_pos = context_sent_attention(
        doc_sents_h, context_pre_h, context_pos_h, pre_params, pos_params, H)
    jax.block_until_ready((ctx_pre, ctx_pos))

    # Sanity check against the f32 reference.  Tolerance covers bf16 MXU
    # operands (f32 accumulation) plus the approximate EUP reciprocal in the
    # softmax denominator; NOT bit-exact vs the f32 PyTorch module.
    ref_pre = _mha_ref(context_pre_h, doc_sents_h, pre_params, H)
    ref_pos = _mha_ref(context_pos_h, doc_sents_h, pos_params, H)
    assert jnp.allclose(ctx_pre, ref_pre, atol=5e-2, rtol=5e-2)
    assert jnp.allclose(ctx_pos, ref_pos, atol=5e-2, rtol=5e-2)
    assert ctx_pre.shape == (B, L, D) and ctx_pos.shape == (B, L, D)

    print("KERNEL_OK")
</pallas_src>

<mosaic_0001>
module attributes {stable_mosaic.version = 11 : i64} {
  func.func @_ctx_attn_kernel(%arg0: i32, %arg1: i32, %arg2: memref<1x64x32xbf16, #tpu.memory_space<vmem>>, %arg3: memref<8x32xf32, #tpu.memory_space<vmem>>, %arg4: memref<1x32x32xbf16, #tpu.memory_space<vmem>>, %arg5: memref<1x1x32xf32, #tpu.memory_space<vmem>>, %arg6: memref<1x32x64xbf16, #tpu.memory_space<vmem>>, %arg7: memref<1x1x64xf32, #tpu.memory_space<vmem>>, %arg8: memref<1x32x32xbf16, #tpu.memory_space<vmem>>, %arg9: memref<1x1x32xf32, #tpu.memory_space<vmem>>, %arg10: memref<1x8x32xf32, #tpu.memory_space<vmem>>) attributes {dimension_semantics = [#tpu.dimension_semantics<parallel>, #tpu.dimension_semantics<parallel>], iteration_bounds = array<i64: 2, 2>, scalar_prefetch = 0 : i64, scratch_operands = 0 : i64, tpu.core_type = #tpu.core_type<tc>, window_params = [{transform_indices = @transform_0, window_bounds = array<i64: 1, 64, 32>}, {transform_indices = @transform_1, window_bounds = array<i64: 8, 32>}, {transform_indices = @transform_2, window_bounds = array<i64: 1, 32, 32>}, {transform_indices = @transform_3, window_bounds = array<i64: 1, 1, 32>}, {transform_indices = @transform_4, window_bounds = array<i64: 1, 32, 64>}, {transform_indices = @transform_5, window_bounds = array<i64: 1, 1, 64>}, {transform_indices = @transform_6, window_bounds = array<i64: 1, 32, 32>}, {transform_indices = @transform_7, window_bounds = array<i64: 1, 1, 32>}, {transform_indices = @transform_8, window_bounds = array<i64: 1, 8, 32>}]} {
    %c0 = arith.constant 0 : index
    %c0_0 = arith.constant 0 : index
    %c0_1 = arith.constant 0 : index
    %0 = vector.load %arg2[%c0, %c0_0, %c0_1] : memref<1x64x32xbf16, #tpu.memory_space<vmem>>, vector<1x64x32xbf16>
    %1 = vector.shape_cast %0 : vector<1x64x32xbf16> to vector<64x32xbf16>
    %c0_2 = arith.constant 0 : index
    %c0_3 = arith.constant 0 : index
    %c0_4 = arith.constant 0 : index
    %2 = vector.load %arg6[%c0_2, %c0_3, %c0_4] : memref<1x32x64xbf16, #tpu.memory_space<vmem>>, vector<1x32x64xbf16>
    %3 = vector.shape_cast %2 : vector<1x32x64xbf16> to vector<32x64xbf16>
    %cst = arith.constant dense<0.000000e+00> : vector<64x64xf32>
    %4 = tpu.matmul %1, %3, %cst {dimension_numbers = #tpu.dot_dimension_numbers<[1], [0], [0], [1], [0, 0, 1, 1], [], []>} : vector<64x32xbf16>, vector<32x64xbf16>, vector<64x64xf32> -> vector<64x64xf32>
    %c0_5 = arith.constant 0 : index
    %c0_6 = arith.constant 0 : index
    %c0_7 = arith.constant 0 : index
    %5 = vector.load %arg7[%c0_5, %c0_6, %c0_7] : memref<1x1x64xf32, #tpu.memory_space<vmem>>, vector<1x1x64xf32>
    %6 = vector.shape_cast %5 : vector<1x1x64xf32> to vector<1x64xf32>
    %7 = vector.broadcast %6 : vector<1x64xf32> to vector<64x64xf32>
    %8 = arith.addf %4, %7 : vector<64x64xf32>
    %9 = arith.truncf %8 : vector<64x64xf32> to vector<64x64xbf16>
    %10 = vector.extract_strided_slice %9 {offsets = [0, 0], sizes = [64, 32], strides = [1, 1]} : vector<64x64xbf16> to vector<64x32xbf16>
    %11 = vector.shape_cast %10 : vector<64x32xbf16> to vector<8x8x32xbf16>
    %12 = vector.extract_strided_slice %9 {offsets = [0, 32], sizes = [64, 32], strides = [1, 1]} : vector<64x64xbf16> to vector<64x32xbf16>
    %13 = vector.shape_cast %12 : vector<64x32xbf16> to vector<8x8x32xbf16>
    %c0_8 = arith.constant 0 : index
    %c0_9 = arith.constant 0 : index
    %14 = vector.load %arg3[%c0_8, %c0_9] : memref<8x32xf32, #tpu.memory_space<vmem>>, vector<8x32xf32>
    %15 = arith.truncf %14 : vector<8x32xf32> to vector<8x32xbf16>
    %c0_10 = arith.constant 0 : index
    %c0_11 = arith.constant 0 : index
    %c0_12 = arith.constant 0 : index
    %16 = vector.load %arg4[%c0_10, %c0_11, %c0_12] : memref<1x32x32xbf16, #tpu.memory_space<vmem>>, vector<1x32x32xbf16>
    %17 = vector.shape_cast %16 : vector<1x32x32xbf16> to vector<32x32xbf16>
    %cst_13 = arith.constant dense<0.000000e+00> : vector<8x32xf32>
    %18 = tpu.matmul %15, %17, %cst_13 {dimension_numbers = #tpu.dot_dimension_numbers<[1], [0], [0], [1], [0, 0, 1, 1], [], []>} : vector<8x32xbf16>, vector<32x32xbf16>, vector<8x32xf32> -> vector<8x32xf32>
    %c0_14 = arith.constant 0 : index
    %c0_15 = arith.constant 0 : index
    %c0_16 = arith.constant 0 : index
    %19 = vector.load %arg5[%c0_14, %c0_15, %c0_16] : memref<1x1x32xf32, #tpu.memory_space<vmem>>, vector<1x1x32xf32>
    %20 = vector.shape_cast %19 : vector<1x1x32xf32> to vector<1x32xf32>
    %21 = vector.broadcast %20 : vector<1x32xf32> to vector<8x32xf32>
    %22 = arith.addf %18, %21 : vector<8x32xf32>
    %cst_17 = arith.constant 0.353553385 : f32
    %23 = vector.broadcast %cst_17 : f32 to vector<8x32xf32>
    %24 = arith.mulf %22, %23 : vector<8x32xf32>
    %25 = arith.truncf %24 : vector<8x32xf32> to vector<8x32xbf16>
    %26 = vector.extract_strided_slice %25 {offsets = [0, 0], sizes = [8, 8], strides = [1, 1]} : vector<8x32xbf16> to vector<8x8xbf16>
    %27 = vector.shape_cast %26 : vector<8x8xbf16> to vector<8x1x8xbf16>
    %28 = vector.extract_strided_slice %11 {offsets = [0, 0, 0], sizes = [8, 8, 8], strides = [1, 1, 1]} : vector<8x8x32xbf16> to vector<8x8x8xbf16>
    %29 = vector.extract_strided_slice %13 {offsets = [0, 0, 0], sizes = [8, 8, 8], strides = [1, 1, 1]} : vector<8x8x32xbf16> to vector<8x8x8xbf16>
    "tpu.trace_start"() <{level = 10 : i32, message = "rqd,rkd->rqk"}> : () -> ()
    %cst_18 = arith.constant dense<0.000000e+00> : vector<8x1x8xf32>
    %30 = tpu.matmul %27, %28, %cst_18 {dimension_numbers = #tpu.dot_dimension_numbers<[2], [2], [1], [1], [0, 0, 0, 1, 1, 1], [0], [0]>} : vector<8x1x8xbf16>, vector<8x8x8xbf16>, vector<8x1x8xf32> -> vector<8x1x8xf32>
    "tpu.trace_stop"() : () -> ()
    %cst_19 = arith.constant dense<0xFF800000> : vector<8x1xf32>
    %31 = vector.multi_reduction <maximumf>, %30, %cst_19 [2] : vector<8x1x8xf32> to vector<8x1xf32>
    %32 = vector.shape_cast %31 : vector<8x1xf32> to vector<8x1x1xf32>
    %33 = vector.broadcast %32 : vector<8x1x1xf32> to vector<8x1x8xf32>
    %34 = arith.subf %30, %33 : vector<8x1x8xf32>
    %35 = math.exp %34 : vector<8x1x8xf32>
    %cst_20 = arith.constant dense<0.000000e+00> : vector<8x1xf32>
    %36 = vector.multi_reduction <add>, %35, %cst_20 [2] : vector<8x1x8xf32> to vector<8x1xf32>
    %37 = vector.shape_cast %36 : vector<8x1xf32> to vector<8x1x1xf32>
    %38 = tpu.reciprocal %37 {approx = true} : vector<8x1x1xf32> -> vector<8x1x1xf32>
    %39 = vector.broadcast %38 : vector<8x1x1xf32> to vector<8x1x8xf32>
    %40 = arith.mulf %35, %39 : vector<8x1x8xf32>
    %41 = arith.truncf %40 : vector<8x1x8xf32> to vector<8x1x8xbf16>
    "tpu.trace_start"() <{level = 10 : i32, message = "rqk,rkd->rqd"}> : () -> ()
    %cst_21 = arith.constant dense<0.000000e+00> : vector<8x1x8xf32>
    %42 = tpu.matmul %41, %29, %cst_21 {dimension_numbers = #tpu.dot_dimension_numbers<[2], [1], [1], [2], [0, 0, 0, 1, 1, 2], [0], [0]>} : vector<8x1x8xbf16>, vector<8x8x8xbf16>, vector<8x1x8xf32> -> vector<8x1x8xf32>
    "tpu.trace_stop"() : () -> ()
    %43 = vector.shape_cast %42 : vector<8x1x8xf32> to vector<8x8xf32>
    %44 = vector.extract_strided_slice %25 {offsets = [0, 8], sizes = [8, 8], strides = [1, 1]} : vector<8x32xbf16> to vector<8x8xbf16>
    %45 = vector.shape_cast %44 : vector<8x8xbf16> to vector<8x1x8xbf16>
    %46 = vector.extract_strided_slice %11 {offsets = [0, 0, 8], sizes = [8, 8, 8], strides = [1, 1, 1]} : vector<8x8x32xbf16> to vector<8x8x8xbf16>
    %47 = vector.extract_strided_slice %13 {offsets = [0, 0, 8], sizes = [8, 8, 8], strides = [1, 1, 1]} : vector<8x8x32xbf16> to vector<8x8x8xbf16>
    "tpu.trace_start"() <{level = 10 : i32, message = "rqd,rkd->rqk"}> : () -> ()
    %cst_22 = arith.constant dense<0.000000e+00> : vector<8x1x8xf32>
    %48 = tpu.matmul %45, %46, %cst_22 {dimension_numbers = #tpu.dot_dimension_numbers<[2], [2], [1], [1], [0, 0, 0, 1, 1, 1], [0], [0]>} : vector<8x1x8xbf16>, vector<8x8x8xbf16>, vector<8x1x8xf32> -> vector<8x1x8xf32>
    "tpu.trace_stop"() : () -> ()
    %cst_23 = arith.constant dense<0xFF800000> : vector<8x1xf32>
    %49 = vector.multi_reduction <maximumf>, %48, %cst_23 [2] : vector<8x1x8xf32> to vector<8x1xf32>
    %50 = vector.shape_cast %49 : vector<8x1xf32> to vector<8x1x1xf32>
    %51 = vector.broadcast %50 : vector<8x1x1xf32> to vector<8x1x8xf32>
    %52 = arith.subf %48, %51 : vector<8x1x8xf32>
    %53 = math.exp %52 : vector<8x1x8xf32>
    %cst_24 = arith.constant dense<0.000000e+00> : vector<8x1xf32>
    %54 = vector.multi_reduction <add>, %53, %cst_24 [2] : vector<8x1x8xf32> to vector<8x1xf32>
    %55 = vector.shape_cast %54 : vector<8x1xf32> to vector<8x1x1xf32>
    %56 = tpu.reciprocal %55 {approx = true} : vector<8x1x1xf32> -> vector<8x1x1xf32>
    %57 = vector.broadcast %56 : vector<8x1x1xf32> to vector<8x1x8xf32>
    %58 = arith.mulf %53, %57 : vector<8x1x8xf32>
    %59 = arith.truncf %58 : vector<8x1x8xf32> to vector<8x1x8xbf16>
    "tpu.trace_start"() <{level = 10 : i32, message = "rqk,rkd->rqd"}> : () -> ()
    %cst_25 = arith.constant dense<0.000000e+00> : vector<8x1x8xf32>
    %60 = tpu.matmul %59, %47, %cst_25 {dimension_numbers = #tpu.dot_dimension_numbers<[2], [1], [1], [2], [0, 0, 0, 1, 1, 2], [0], [0]>} : vector<8x1x8xbf16>, vector<8x8x8xbf16>, vector<8x1x8xf32> -> vector<8x1x8xf32>
    "tpu.trace_stop"() : () -> ()
    %61 = vector.shape_cast %60 : vector<8x1x8xf32> to vector<8x8xf32>
    %62 = vector.extract_strided_slice %25 {offsets = [0, 16], sizes = [8, 8], strides = [1, 1]} : vector<8x32xbf16> to vector<8x8xbf16>
    %63 = vector.shape_cast %62 : vector<8x8xbf16> to vector<8x1x8xbf16>
    %64 = vector.extract_strided_slice %11 {offsets = [0, 0, 16], sizes = [8, 8, 8], strides = [1, 1, 1]} : vector<8x8x32xbf16> to vector<8x8x8xbf16>
    %65 = vector.extract_strided_slice %13 {offsets = [0, 0, 16], sizes = [8, 8, 8], strides = [1, 1, 1]} : vector<8x8x32xbf16> to vector<8x8x8xbf16>
    "tpu.trace_start"() <{level = 10 : i32, message = "rqd,rkd->rqk"}> : () -> ()
    %cst_26 = arith.constant dense<0.000000e+00> : vector<8x1x8xf32>
    %66 = tpu.matmul %63, %64, %cst_26 {dimension_numbers = #tpu.dot_dimension_numbers<[2], [2], [1], [1], [0, 0, 0, 1, 1, 1], [0], [0]>} : vector<8x1x8xbf16>, vector<8x8x8xbf16>, vector<8x1x8xf32> -> vector<8x1x8xf32>
    "tpu.trace_stop"() : () -> ()
    %cst_27 = arith.constant dense<0xFF800000> : vector<8x1xf32>
    %67 = vector.multi_reduction <maximumf>, %66, %cst_27 [2] : vector<8x1x8xf32> to vector<8x1xf32>
    %68 = vector.shape_cast %67 : vector<8x1xf32> to vector<8x1x1xf32>
    %69 = vector.broadcast %68 : vector<8x1x1xf32> to vector<8x1x8xf32>
    %70 = arith.subf %66, %69 : vector<8x1x8xf32>
    %71 = math.exp %70 : vector<8x1x8xf32>
    %cst_28 = arith.constant dense<0.000000e+00> : vector<8x1xf32>
    %72 = vector.multi_reduction <add>, %71, %cst_28 [2] : vector<8x1x8xf32> to vector<8x1xf32>
    %73 = vector.shape_cast %72 : vector<8x1xf32> to vector<8x1x1xf32>
    %74 = tpu.reciprocal %73 {approx = true} : vector<8x1x1xf32> -> vector<8x1x1xf32>
    %75 = vector.broadcast %74 : vector<8x1x1xf32> to vector<8x1x8xf32>
    %76 = arith.mulf %71, %75 : vector<8x1x8xf32>
    %77 = arith.truncf %76 : vector<8x1x8xf32> to vector<8x1x8xbf16>
    "tpu.trace_start"() <{level = 10 : i32, message = "rqk,rkd->rqd"}> : () -> ()
    %cst_29 = arith.constant dense<0.000000e+00> : vector<8x1x8xf32>
    %78 = tpu.matmul %77, %65, %cst_29 {dimension_numbers = #tpu.dot_dimension_numbers<[2], [1], [1], [2], [0, 0, 0, 1, 1, 2], [0], [0]>} : vector<8x1x8xbf16>, vector<8x8x8xbf16>, vector<8x1x8xf32> -> vector<8x1x8xf32>
    "tpu.trace_stop"() : () -> ()
    %79 = vector.shape_cast %78 : vector<8x1x8xf32> to vector<8x8xf32>
    %80 = vector.extract_strided_slice %25 {offsets = [0, 24], sizes = [8, 8], strides = [1, 1]} : vector<8x32xbf16> to vector<8x8xbf16>
    %81 = vector.shape_cast %80 : vector<8x8xbf16> to vector<8x1x8xbf16>
    %82 = vector.extract_strided_slice %11 {offsets = [0, 0, 24], sizes = [8, 8, 8], strides = [1, 1, 1]} : vector<8x8x32xbf16> to vector<8x8x8xbf16>
    %83 = vector.extract_strided_slice %13 {offsets = [0, 0, 24], sizes = [8, 8, 8], strides = [1, 1, 1]} : vector<8x8x32xbf16> to vector<8x8x8xbf16>
    "tpu.trace_start"() <{level = 10 : i32, message = "rqd,rkd->rqk"}> : () -> ()
    %cst_30 = arith.constant dense<0.000000e+00> : vector<8x1x8xf32>
    %84 = tpu.matmul %81, %82, %cst_30 {dimension_numbers = #tpu.dot_dimension_numbers<[2], [2], [1], [1], [0, 0, 0, 1, 1, 1], [0], [0]>} : vector<8x1x8xbf16>, vector<8x8x8xbf16>, vector<8x1x8xf32> -> vector<8x1x8xf32>
    "tpu.trace_stop"() : () -> ()
    %cst_31 = arith.constant dense<0xFF800000> : vector<8x1xf32>
    %85 = vector.multi_reduction <maximumf>, %84, %cst_31 [2] : vector<8x1x8xf32> to vector<8x1xf32>
    %86 = vector.shape_cast %85 : vector<8x1xf32> to vector<8x1x1xf32>
    %87 = vector.broadcast %86 : vector<8x1x1xf32> to vector<8x1x8xf32>
    %88 = arith.subf %84, %87 : vector<8x1x8xf32>
    %89 = math.exp %88 : vector<8x1x8xf32>
    %cst_32 = arith.constant dense<0.000000e+00> : vector<8x1xf32>
    %90 = vector.multi_reduction <add>, %89, %cst_32 [2] : vector<8x1x8xf32> to vector<8x1xf32>
    %91 = vector.shape_cast %90 : vector<8x1xf32> to vector<8x1x1xf32>
    %92 = tpu.reciprocal %91 {approx = true} : vector<8x1x1xf32> -> vector<8x1x1xf32>
    %93 = vector.broadcast %92 : vector<8x1x1xf32> to vector<8x1x8xf32>
    %94 = arith.mulf %89, %93 : vector<8x1x8xf32>
    %95 = arith.truncf %94 : vector<8x1x8xf32> to vector<8x1x8xbf16>
    "tpu.trace_start"() <{level = 10 : i32, message = "rqk,rkd->rqd"}> : () -> ()
    %cst_33 = arith.constant dense<0.000000e+00> : vector<8x1x8xf32>
    %96 = tpu.matmul %95, %83, %cst_33 {dimension_numbers = #tpu.dot_dimension_numbers<[2], [1], [1], [2], [0, 0, 0, 1, 1, 2], [0], [0]>} : vector<8x1x8xbf16>, vector<8x8x8xbf16>, vector<8x1x8xf32> -> vector<8x1x8xf32>
    "tpu.trace_stop"() : () -> ()
    %97 = vector.shape_cast %96 : vector<8x1x8xf32> to vector<8x8xf32>
    %98 = tpu.concatenate %43, %61, %79, %97 in 1 : vector<8x8xf32>, vector<8x8xf32>, vector<8x8xf32>, vector<8x8xf32> -> vector<8x32xf32>
    %99 = arith.truncf %98 : vector<8x32xf32> to vector<8x32xbf16>
    %c0_34 = arith.constant 0 : index
    %c0_35 = arith.constant 0 : index
    %c0_36 = arith.constant 0 : index
    %100 = vector.load %arg8[%c0_34, %c0_35, %c0_36] : memref<1x32x32xbf16, #tpu.memory_space<vmem>>, vector<1x32x32xbf16>
    %101 = vector.shape_cast %100 : vector<1x32x32xbf16> to vector<32x32xbf16>
    %cst_37 = arith.constant dense<0.000000e+00> : vector<8x32xf32>
    %102 = tpu.matmul %99, %101, %cst_37 {dimension_numbers = #tpu.dot_dimension_numbers<[1], [0], [0], [1], [0, 0, 1, 1], [], []>} : vector<8x32xbf16>, vector<32x32xbf16>, vector<8x32xf32> -> vector<8x32xf32>
    %c0_38 = arith.constant 0 : index
    %c0_39 = arith.constant 0 : index
    %c0_40 = arith.constant 0 : index
    %103 = vector.load %arg9[%c0_38, %c0_39, %c0_40] : memref<1x1x32xf32, #tpu.memory_space<vmem>>, vector<1x1x32xf32>
    %104 = vector.shape_cast %103 : vector<1x1x32xf32> to vector<1x32xf32>
    %105 = vector.broadcast %104 : vector<1x32xf32> to vector<8x32xf32>
    %106 = arith.addf %102, %105 : vector<8x32xf32>
    %c0_41 = arith.constant 0 : index
    %c0_42 = arith.constant 0 : index
    %c0_43 = arith.constant 0 : index
    %107 = vector.load %arg10[%c0_41, %c0_42, %c0_43] : memref<1x8x32xf32, #tpu.memory_space<vmem>>, vector<1x8x32xf32>
    %108 = vector.shape_cast %107 : vector<1x8x32xf32> to vector<8x32xf32>
    %109 = vector.shape_cast %106 : vector<8x32xf32> to vector<1x8x32xf32>
    tpu.vector_store %arg10[%c0_41, %c0_42, %c0_43], %109 {strides = array<i32>} : memref<1x8x32xf32, #tpu.memory_space<vmem>>, vector<1x8x32xf32>,
    return
  }
  func.func @transform_0(%arg0: i32, %arg1: i32) -> (i32, i32, i32) {
    %c0_i32 = arith.constant 0 : i32
    %c0_i32_0 = arith.constant 0 : i32
    return %arg0, %arg1, %c0_i32 : i32, i32, i32
  }
  func.func @transform_1(%arg0: i32, %arg1: i32) -> (i32, i32) {
    %c0_i32 = arith.constant 0 : i32
    %c0_i32_0 = arith.constant 0 : i32
    return %arg1, %c0_i32 : i32, i32
  }
  func.func @transform_2(%arg0: i32, %arg1: i32) -> (i32, i32, i32) {
    %c0_i32 = arith.constant 0 : i32
    %c0_i32_0 = arith.constant 0 : i32
    %c0_i32_1 = arith.constant 0 : i32
    return %arg0, %c0_i32, %c0_i32_0 : i32, i32, i32
  }
  func.func @transform_3(%arg0: i32, %arg1: i32) -> (i32, i32, i32) {
    %c0_i32 = arith.constant 0 : i32
    %c0_i32_0 = arith.constant 0 : i32
    %c0_i32_1 = arith.constant 0 : i32
    return %arg0, %c0_i32, %c0_i32_0 : i32, i32, i32
  }
  func.func @transform_4(%arg0: i32, %arg1: i32) -> (i32, i32, i32) {
    %c0_i32 = arith.constant 0 : i32
    %c0_i32_0 = arith.constant 0 : i32
    %c0_i32_1 = arith.constant 0 : i32
    return %arg0, %c0_i32, %c0_i32_0 : i32, i32, i32
  }
  func.func @transform_5(%arg0: i32, %arg1: i32) -> (i32, i32, i32) {
    %c0_i32 = arith.constant 0 : i32
    %c0_i32_0 = arith.constant 0 : i32
    %c0_i32_1 = arith.constant 0 : i32
    return %arg0, %c0_i32, %c0_i32_0 : i32, i32, i32
  }
  func.func @transform_6(%arg0: i32, %arg1: i32) -> (i32, i32, i32) {
    %c0_i32 = arith.constant 0 : i32
    %c0_i32_0 = arith.constant 0 : i32
    %c0_i32_1 = arith.constant 0 : i32
    return %arg0, %c0_i32, %c0_i32_0 : i32, i32, i32
  }
  func.func @transform_7(%arg0: i32, %arg1: i32) -> (i32, i32, i32) {
    %c0_i32 = arith.constant 0 : i32
    %c0_i32_0 = arith.constant 0 : i32
    %c0_i32_1 = arith.constant 0 : i32
    return %arg0, %c0_i32, %c0_i32_0 : i32, i32, i32
  }
  func.func @transform_8(%arg0: i32, %arg1: i32) -> (i32, i32, i32) {
    %c0_i32 = arith.constant 0 : i32
    %c0_i32_0 = arith.constant 0 : i32
    return %arg0, %arg1, %c0_i32 : i32, i32, i32
  }
}

</mosaic_0001>

<bundles_post_ra>
// kernel: tpu_custom_call.1
= control target key start
LH: loop header
LB: loop body
LE: loop exit
PB: predicated region body
PF: predicated region fallthrough
CT: control target
= control target key end

     0   :  { %s4022_s0 = inlined_call_operand.vmem [shape: bf16[2,128,32], index: 0, kind: input, shape index: {}]   ;;  %s4023_s1 = inlined_call_operand.vmem [shape: f32[16,32], index: 1, kind: input, shape index: {}]   ;;  %s4024_s2 = inlined_call_operand.vmem [shape: bf16[2,32,32], index: 2, kind: input, shape index: {}]   ;;  %s4025_s3 = inlined_call_operand.vmem [shape: f32[2,1,32], index: 3, kind: input, shape index: {}]   ;;  %s4026_s4 = inlined_call_operand.vmem [shape: bf16[2,32,64], index: 4, kind: input, shape index: {}]   ;;  %s4027_s5 = inlined_call_operand.vmem [shape: f32[2,1,64], index: 5, kind: input, shape index: {}]   ;;  %s4028_s6 = inlined_call_operand.vmem [shape: bf16[2,32,32], index: 6, kind: input, shape index: {}]   ;;  %s4029_s7 = inlined_call_operand.vmem [shape: f32[2,1,32], index: 7, kind: input, shape index: {}]   ;;  %s4030_s8 = inlined_call_operand.hbm [shape: f32[2,16,32], index: 8, kind: output, shape index: {}]  }
   0x1   :  { %4037 = sst [smem:[#allocation12_spill]] %s4026_s4 }
   0x2   :  { %13 = vsyncpa [#allocation3], 0 }
   0x3   :  { %15 = vsyncpa [#allocation3 + $0x1], 0  ;;  %s3249_s27 = smov 0   ;;  %s3251_s28 = smov 0  }
   0x4   :  { %s3253_s29 = smov 0   ;;  %s3255_s30 = smov 0  }
   0x5   :  { %s3257_s9 = smov 0   ;;  %s3259_s10 = smov 0  }
   0x6   :  { %s3261_s11 = smov 0   ;;  %s3263_s12 = smov 0  }
   0x7 LB: > { %4038 = sst [smem:[#allocation5_spill]] %s3172_s29  ;;  %s2738_s13 = sadd.s32 4294967295, %s3192_s12   ;;  %s3192_s12 = sphi %s3263_s12, %s21_s12   ;;  %s3188_s11 = sphi %s3261_s11, %s4054_s11   ;;  %s3184_s10 = sphi %s3259_s10, %s4053_s10   ;;  %s3180_s9 = sphi %s3257_s9, %s4052_s9   ;;  %s3176_s30 = sphi %s3255_s30, %s4051_s30   ;;  %s3172_s29 = sphi %s3253_s29, %s4050_s29   ;;  %s3168_s28 = sphi %s3251_s28, %s4056_s28   ;;  %s3164_s27 = sphi %s3249_s27, %s4055_s27  }
   0x8   : > { %4039 = sst [smem:[#allocation6_spill]] %s3184_s10  ;;  %s2739_s14 = sadd.s32 4294967294, %s3192_s12  }
   0x9   : > { %4040 = sst [smem:[#allocation7_spill]] %s3188_s11  ;;  %s30_s15 = sadd.s32 1, %s3184_s10 }
   0xa   : > { %p31_p0 = scmp.ge.s32.totalorder %s30_s15, 2  ;;  %s33_s16 = sadd.s32 1, %s3188_s11 }
   0xb   : > { %p262_p1 = scmp.ne.s32.totalorder %s3172_s29, %s3168_s28  ;;  %p263_p2 = scmp.eq.s32.totalorder %s2738_s13, 3 }
   0xc   : > { %s4058_s15 = smov (%p31_p0, %s30_s15), 0  ;;  %s4060_s16 = smov (!%p31_p0, %s33_s16), %s3188_s11 }
   0xd   : > { %4041 = sst [smem:[#allocation8_spill]] %s4058_s15  ;;  %s248_s17 = ssub.s32 %s3184_s10, %s4058_s15 }
   0xe   : > { %p3300_p3 = por %p263_p2, %p262_p1  ;;  %p35_p4 = scmp.ge.s32.totalorder %s4060_s16, 2 }
   0xf   : > { %p268_p5 = scmp.ne.s32.totalorder %s3168_s28, %s3164_s27  ;;  %p269_p6 = scmp.eq.s32.totalorder %s2739_s14, 3 }
  0x10   : > { %p2742_p7 = scmp.ge.s32.totalorder %s3192_s12, 1  ;;  %s4062_s16 = smov (%p35_p4, %s4060_s16), 0 }
  0x11   : > { %4043 = sst [smem:[#allocation9_spill]] %s4062_s16  ;;  %p3309_p8 = por %p269_p6, %p268_p5 }
  0x12   : > { %p349_p9 = scmp.lt.s32.totalorder %s3192_s12, 5  ;;  %s247_s20 = ssub.s32 %s3188_s11, %s4062_s16 }
  0x13   : > { %s4044_s19 = scalar_select %p3309_p8, 1, 0 }
  0x14   : > { %s252_s21 = sadd.s32 1, %s3172_s29  ;;  %s249_s22 = sor.u32 %s248_s17, %s247_s20 }
  0x15   : > { %4045 = sst [smem:[#allocation10_spill]] %s4044_s19  ;;  %p350_p10 = pnand %p2742_p7, %p349_p9 }
  0x16   : > { %p250_p11 = scmp.eq.s32.totalorder %s249_s22, 0  ;;  %s2744_s24 = sshll.u32 (!%p350_p10), %s3176_s30, 3 }
  0x17   : > { %353 = sbr.rel (%p350_p10) target bundleno = 2419 (0x973), region = 52  ;;  %p416_p12 = scmp.lt.s32.totalorder (!%p350_p10), %s3180_s9, 1 }
  0x18   : > { %s3318_s23 = scalar_select %p250_p11, %s3172_s29, %s252_s21  }
  0x19   : > { %p418_p13 = scmp.lt.s32.totalorder (!%p350_p10), %s2744_s24, 15  ;;  %p425_p0 = scmp.lt.s32.totalorder (!%p350_p10), %s3176_s30, 1 }
  0x1a   : > { %4046 = sst [smem:[#allocation11_spill]] %s3318_s23  ;;  %s3195_s29 = smov (!%p350_p10), 120  }
  0x1b   : > { %s4047_s4 = sld [smem:[#allocation12_spill]] (!%p350_p10)  ;;  %s3198_s19 = smov (!%p350_p10), 80  }
  0x1c   : > { %s3324_s25 = scalar_select %p416_p12, %s3180_s9, 1  ;;  %vm502_vm0 = vcmask 261120   ;;  %vm621_vm1 = vcmask 64512   ;;  %vm594_vm2 = vcmask 1040384   ;;  %vm599_vm3 = vcmask 1041409  }
  0x1d   : > { %s4064_s24 = smov (!%p418_p13, %s2744_s24), 15  ;;  %vm603_vm4 = vcmask 1042434   ;;  %vm607_vm5 = vcmask 1043459   ;;  %vm893_vm6 = vcmask 1043456   ;;  %vm788_vm7 = vcmask 57344  }
  0x1e   : > { %s3327_s26 = sshll.u32 %s3324_s25, 4  ;;  %s444_s17 = scalar_lea.vmem %s4027_s5, %s3324_s25  ;;  %vm2437_vm8 = vcmask 1044484   ;;  %vm2440_vm9 = vcmask 1045509   ;;  %vm2443_vm10 = vcmask 1046534   ;;  %vm2446_vm11 = vcmask 1047559  }
  0x1f   : > { %s421_s20 = sadd.s32 %s3327_s26, %s4064_s24  ;;  %s433_s23 = scalar_lea.vmem %s4024_s2, %s3327_s26  ;;  %v3360_v10 = vld [vmem:[%s444_s17] ss:$0 sm:$0xff]  ;;  %vm2525_vm12 = vcmask 130048   ;;  %vm2527_vm13 = vcmask 195584  }
  0x20   : > { %s2746_s15 = sshll.u32 %s421_s20, 2  ;;  %v2883_v1 = vld [vmem:[%s433_s23 + $0x8] sm:$0xff]  ;;  %v2882_v3 = vld [vmem:[%s433_s23] sm:$0xff]  ;;  %s436_s11 = scalar_lea.vmem %s4025_s3, %s3324_s25 }
  0x21   : > { %s441_s16 = scalar_lea.vmem %s4047_s4, %s3327_s26  ;;  %s423_s13 = scalar_lea.vmem %s4022_s0, %s2746_s15  ;;  %583 = vmatpush.bf16.msra.mxu1 %v2883_v1  ;;  %v2968_v11 = vld [vmem:[%s436_s11] ss:$0 sm:$0xff] }
  0x22   : > { %v2881_v0 = vld [vmem:[%s441_s16 + $0x8] sm:$0xff]  ;;  %v2880_v2 = vld [vmem:[%s441_s16] sm:$0xff]  ;;  %s426_s14 = scalar_select %p425_p0, %s3176_s30, 1  ;;  %v2878_v8 = vld [vmem:[%s423_s13 + $0x10] sm:$0xff] }
  0x23   : > { %521 = vmatpush.bf16.msra.mxu0 %v2881_v0  ;;  %v2876_v4 = vld [vmem:[%s423_s13] sm:$0xff]  ;;  %v2877_v7 = vld [vmem:[%s423_s13 + $0x8] sm:$0xff]  ;;  %v2879_v9 = vld [vmem:[%s423_s13 + $0x18] sm:$0xff]  ;;  %s3194_s4 = smov 96   ;;  %s3196_s15 = smov 88  }
  0x24   : > { %s2747_s24 = sshll.u32 %s426_s14, 3  ;;  %s3197_s16 = smov 112  }
  0x25   : > { %s428_s22 = scalar_lea.vmem %s4023_s1, %s2747_s24  ;;  %584 = vmatpush.bf16.msra.mxu1 %v2882_v3  ;;  %s3199_s23 = smov 104  }
  0x26   : > { %v552_v5 = vld [vmem:[%s428_s22] sm:$0xff]  ;;  %s3200_s17 = smov 72   ;;  %s3201_s13 = smov 16  }
  0x27   : > { %522 = vmatpush.bf16.msra.mxu0 %v2880_v2  ;;  %v553_v6 = vpack.c.bf16 %v552_v5, %v552_v5  ;;  %s3202_s14 = smov 8   ;;  %s452_s20 = scalar_lea.vmem %s4029_s7, %s3324_s25 }
  0x28   : > { %s449_s11 = scalar_lea.vmem %s4028_s6, %s3327_s26  ;;  %s3203_s26 = smov 24  }
  0x29   : > { %2790 = vmatmul.msk.bf16.vlgmr.msra.gmra.mxu1 %vm502_vm0, %v553_v6 }
  0x2a   : > { %2778 = vmatmul.msk.bf16.vlgmr.msra.gmra.mxu0 %vm502_vm0, %v2876_v4 }
  0x3a   : > { %2779 = vmatmul.msk.bf16.gmra.mxu0 %vm502_vm0, %v2877_v7 }
  0x4a   : > { %2780 = vmatmul.msk.bf16.gmra.mxu0 %vm502_vm0, %v2878_v8 }
  0x5a   : > { %2781 = vmatmul.msk.bf16.gmra.mxu0 %vm502_vm0, %v2879_v9 }
  0xa6   : > { %v586_v14 = vpop.f32.mrf.mxu1 }
  0xa7   : > { %v524_v12 = vpop.f32.mrf.mxu0  ;;  %v587_v15 = vadd.f32 %v2968_v11, %v586_v14 }
  0xa8   : > { %v525_v13 = vadd.f32 %v3360_v10, %v524_v12 }
  0xa9   : > { %v590_v17 = vmul.f32 0.35355338, %v587_v15 }
  0xaa   : > { %v544_v16 = vpack.c.bf16 %v525_v13, %v525_v13 }
  0xab   : > { %v3364_v20 = vpack.c.bf16 %v590_v17, %v590_v17 }
  0xac   : > { %v886_v18 = vunpack.c.l.b16 %v544_v16  ;;  %v626_v19 = vsel %vm621_vm1, %v544_v16, 0 }
  0xad   : > { %635 = vmatpush.bf16.xpose.msra.mxu2 %v626_v19  ;;  %v3369_v22 = vrot.slane %v3364_v20, 3 }
  0xae   : > { %v3366_v21 = vpack.c.b16 %v886_v18, %v886_v18  ;;  %v588_v25 = vpop.f32.mrf.mxu1 }
  0xaf   : > { %v526_v23 = vpop.f32.mrf.mxu0  ;;  %v597_v26 = vsel %vm594_vm2, %v3364_v20, %v3369_v22  ;;  %v600_v27 = vsel %vm599_vm3, %v3364_v20, %v3369_v22  ;;  %v604_v55 = vsel %vm603_vm4, %v3364_v20, %v3369_v22  ;;  %v608_v9 = vsel %vm607_vm5, %v3364_v20, %v3369_v22 }
  0xb0   : > { %v527_v24 = vadd.f32 %v3360_v10, %v526_v23  ;;  %888 = vrot.lane.b32.xlu2 %v3366_v21, %s3194_s4  ;;  %v2791_v28 = vpack.i.b16 %v597_v26, %v597_v26  ;;  %v612_v30 = vunpack.i.h.s16 %v597_v26  ;;  %v602_v31 = vrot.slane %v600_v27, 1 }
  0xb1   : > { %v606_v59 = vrot.slane %v604_v55, 2  ;;  %v610_v13 = vrot.slane %v608_v9, 3 }
  0xb2   : > { %v545_v29 = vpack.c.bf16 %v527_v24, %v527_v24  ;;  %v3379_v32 = vperm.slane %v2791_v28, 0  ;;  %v641_v35 = vpack.i.b16 %v612_v30, %v612_v30  ;;  %v2794_v40 = vpack.i.b16 %v602_v31, %v602_v31 }
  0xb3   : > { %v614_v49 = vunpack.i.h.s16 %v602_v31  ;;  %v2797_v63 = vpack.i.b16 %v606_v59, %v606_v59  ;;  %v616_v3 = vunpack.i.h.s16 %v606_v59  ;;  %v2800_v19 = vpack.i.b16 %v610_v13, %v610_v13 }
  0xb4   : > { %v647_v33 = vsel %vm621_vm1, %v545_v29, 0  ;;  %v911_v34 = vunpack.c.l.b16 %v545_v29  ;;  %2792 = vmatmul.msk.bf16.vlgmr.msra.gmra.mxu2 %vm621_vm1, %v3379_v32  ;;  %v3386_v37 = vperm.slane %v641_v35, 0  ;;  %v3396_v44 = vperm.slane %v2794_v40, 0 }
  0xb5   : > { %656 = vmatpush.bf16.xpose.msra.mxu3 %v647_v33  ;;  %v683_v53 = vpack.i.b16 %v614_v49, %v614_v49  ;;  %v3430_v4 = vperm.slane %v2797_v63, 0  ;;  %v725_v8 = vpack.i.b16 %v616_v3, %v616_v3  ;;  %v3455_v24 = vperm.slane %v2800_v19, 0 }
  0xb6   : > { %v3384_v36 = vpack.c.b16 %v911_v34, %v911_v34  ;;  %1101 = vrot.lane.b32.xlu0 %v3386_v37, %s3195_s29  ;;  %v618_v25 = vunpack.i.h.s16 %v610_v13 }
  0xb7   : > { %v529_v38 = vpop.f32.mrf.mxu0  ;;  %v3420_v58 = vperm.slane %v683_v53, 0  ;;  %v3443_v15 = vperm.slane %v725_v8, 0 }
  0xb8   : > { %v530_v39 = vadd.f32 %v3360_v10, %v529_v38  ;;  %913 = vrot.lane.b32.xlu1 %v3384_v36, %s3194_s4  ;;  %v767_v27 = vpack.i.b16 %v618_v25, %v618_v25 }
  0xba   : > { %v546_v41 = vpack.c.bf16 %v530_v39, %v530_v39  ;;  %v3461_v28 = vperm.slane %v767_v27, 0 }
  0xbc   : > { %v935_v42 = vunpack.c.l.b16 %v546_v41  ;;  %2793 = vmatmul.msk.bf16.vlgmr.msra.gmra.mxu3 %vm621_vm1, %v3386_v37  ;;  %v668_v43 = vsel %vm621_vm1, %v546_v41, 0 }
  0xbd   : > { %677 = vmatpush.bf16.xpose.msrb.mxu1 %v668_v43 }
  0xbe   : > { %v3398_v45 = vpack.c.b16 %v935_v42, %v935_v42  ;;  %1124 = vrot.lane.b32.xlu0 %v3396_v44, %s3195_s29 }
  0xbf   : > { %v531_v46 = vpop.f32.mrf.mxu0 }
  0xc0   : > { %v532_v47 = vadd.f32 %v3360_v10, %v531_v46  ;;  %937 = vrot.lane.b32.xlu2 %v3398_v45, %s3194_s4 }
  0xc2   : > { %v547_v48 = vpack.c.bf16 %v532_v47, %v532_v47 }
  0xc4   : > { %v959_v50 = vunpack.c.l.b16 %v547_v48  ;;  %2795 = vmatmul.msk.bf16.vlgmr.msrb.gmra.mxu1 %vm621_vm1, %v3396_v44  ;;  %v689_v51 = vsel %vm621_vm1, %v547_v48, 0 }
  0xc5   : > { %698 = vmatpush.bf16.xpose.msrb.mxu2 %v689_v51 }
  0xc6   : > { %v3408_v52 = vpack.c.b16 %v959_v50, %v959_v50  ;;  %1103 = vrot.lane.b32.xlu0 %v3384_v36, %s3195_s29 }
  0xc7   : > { %v534_v54 = vpop.f32.mrf.mxu0 }
  0xc8   : > { %v535_v56 = vadd.f32 %v3360_v10, %v534_v54  ;;  %961 = vrot.lane.b32.xlu1 %v3408_v52, %s3194_s4  ;;  %1126 = vrot.lane.b32.xlu2 %v3398_v45, %s3195_s29 }
  0xca   : > { %v548_v57 = vpack.c.bf16 %v535_v56, %v535_v56 }
  0xcc   : > { %v983_v60 = vunpack.c.l.b16 %v548_v57  ;;  %2796 = vmatmul.msk.bf16.vlgmr.msrb.gmra.mxu2 %vm621_vm1, %v3420_v58  ;;  %v710_v61 = vsel %vm621_vm1, %v548_v57, 0 }
  0xcd   : > { %719 = vmatpush.bf16.xpose.msrb.mxu3 %v710_v61 }
  0xce   : > { %v3425_v62 = vpack.c.b16 %v983_v60, %v983_v60 }
  0xcf   : > { %v536_v0 = vpop.f32.mrf.mxu0 }
  0xd0   : > { %v537_v1 = vadd.f32 %v3360_v10, %v536_v0  ;;  %985 = vrot.lane.b32.xlu0 %v3425_v62, %s3194_s4 }
  0xd2   : > { %v549_v2 = vpack.c.bf16 %v537_v1, %v537_v1 }
  0xd4   : > { %v1007_v5 = vunpack.c.l.b16 %v549_v2  ;;  %2798 = vmatmul.msk.bf16.vlgmr.msrb.gmra.mxu3 %vm621_vm1, %v3430_v4  ;;  %v731_v6 = vsel %vm621_vm1, %v549_v2, 0 }
  0xd5   : > { %740 = vmatpush.bf16.xpose.msra.mxu1 %v731_v6 }
  0xd6   : > { %v3435_v7 = vpack.c.b16 %v1007_v5, %v1007_v5 }
  0xd7   : > { %v539_v11 = vpop.f32.mrf.mxu0 }
  0xd8   : > { %v540_v12 = vadd.f32 %v3360_v10, %v539_v11  ;;  %1009 = vrot.lane.b32.xlu2 %v3435_v7, %s3194_s4 }
  0xda   : > { %v550_v14 = vpack.c.bf16 %v540_v12, %v540_v12 }
  0xdc   : > { %v752_v16 = vsel %vm621_vm1, %v550_v14, 0  ;;  %v1031_v17 = vunpack.c.l.b16 %v550_v14  ;;  %2799 = vmatmul.msk.bf16.vlgmr.msra.gmra.mxu1 %vm621_vm1, %v3443_v15 }
  0xdd   : > { %761 = vmatpush.bf16.xpose.msra.mxu2 %v752_v16 }
  0xde   : > { %v3448_v18 = vpack.c.b16 %v1031_v17, %v1031_v17 }
  0xdf   : > { %v541_v20 = vpop.f32.mrf.mxu0 }
  0xe0   : > { %v542_v22 = vadd.f32 %v3360_v10, %v541_v20  ;;  %1033 = vrot.lane.b32.xlu1 %v3448_v18, %s3194_s4 }
  0xe2   : > { %v3453_v23 = vpack.c.bf16 %v542_v22, %v542_v22 }
  0xe4   : > { %2801 = vmatmul.msk.bf16.vlgmr.msra.gmra.mxu2 %vm621_vm1, %v3455_v24  ;;  %v773_v26 = vsel %vm621_vm1, %v3453_v23, 0  ;;  %v1055_v19 = vunpack.c.l.b16 %v3453_v23 }
  0xe5   : > { %782 = vmatpush.bf16.xpose.msra.mxu3 %v773_v26 }
  0xe6   : > { %v3495_v20 = vpack.c.b16 %v1055_v19, %v1055_v19 }
  0xec   : > { %2802 = vmatmul.msk.bf16.vlgmr.msra.gmra.mxu3 %vm621_vm1, %v3461_v28 }
 0x10a   : > { %v889_v10 = vpop.permute.xlu2 %888 }
 0x10b   : > { %v895_v29 = vsel %vm893_vm6, %v889_v10, 0 }
 0x10c   : > { %904 = vmatpush.bf16.msrb.mxu1 %v895_v29 }
 0x11a   : > { %v938_v30 = vpop.permute.xlu2 %937 }
 0x11b   : > { %v943_v31 = vsel %vm893_vm6, %v938_v30, 0 }
 0x11c   : > { %952 = vmatpush.bf16.msrb.mxu3 %v943_v31 }
 0x122   : > { %v3467_v33 = vpop.permute.xlu2 %1126 }
 0x128   : > { %v3469_v34 = vpop.permute.xlu0 %1101 }
 0x12a   : > { %v914_v35 = vpop.permute.xlu1 %913 }
 0x12b   : > { %v919_v38 = vsel %vm893_vm6, %v914_v35, 0 }
 0x12c   : > { %928 = vmatpush.bf16.msrb.mxu2 %v919_v38 }
 0x130   : > { %v3472_v39 = vpop.permute.xlu0 %1124 }
 0x132   : > { %v1010_v40 = vpop.permute.xlu2 %1009 }
 0x133   : > { %v1015_v41 = vsel %vm893_vm6, %v1010_v40, 0 }
 0x134   : > { %1024 = vmatpush.bf16.msra.mxu2 %v1015_v41 }
 0x137   : > { %v637_v42 = vpop.f32.mrf.mxu2 }
 0x138   : > { %v3475_v43 = vpop.permute.xlu0 %1103  ;;  %v789_v47 = vsel %vm788_vm7, %v637_v42, -inf }
 0x139   : > { %790 = vmax.xlane.f32.xlu2 %v789_v47 }
 0x13a   : > { %v962_v46 = vpop.permute.xlu1 %961 }
 0x13b   : > { %v967_v48 = vsel %vm893_vm6, %v962_v46, 0 }
 0x13c   : > { %976 = vmatpush.bf16.msrb.mxu0 %v967_v48 }
 0x13f   : > { %v658_v49 = vpop.f32.mrf.mxu3  ;;  %v639_v53 = vpop.f32.mrf.mxu2 }
 0x140   : > { %v792_v50 = vsel %vm788_vm7, %v658_v49, -inf }
 0x141   : > { %v679_v51 = vpop.f32.mrf.mxu1  ;;  %793 = vmax.xlane.f32.xlu0 %v792_v50 }
 0x142   : > { %v986_v54 = vpop.permute.xlu0 %985  ;;  %v795_v57 = vsel %vm788_vm7, %v679_v51, -inf }
 0x143   : > { %v991_v55 = vsel %vm893_vm6, %v986_v54, 0 }
 0x144   : > { %1000 = vmatpush.bf16.msra.mxu1 %v991_v55 }
 0x147   : > { %v660_v56 = vpop.f32.mrf.mxu3 }
 0x149   : > { %v681_v59 = vpop.f32.mrf.mxu1  ;;  %796 = vmax.xlane.f32.xlu0 %v795_v57 }
 0x14f   : > { %v700_v60 = vpop.f32.mrf.mxu2 }
 0x150   : > { %v798_v61 = vsel %vm788_vm7, %v700_v60, -inf }
 0x151   : > { %799 = vmax.xlane.f32.xlu2 %v798_v61 }
 0x152   : > { %v1034_v63 = vpop.permute.xlu1 %1033 }
 0x153   : > { %v1039_v0 = vsel %vm893_vm6, %v1034_v63, 0 }
 0x154   : > { %1048 = vmatpush.bf16.msra.mxu3 %v1039_v0 }
 0x157   : > { %v702_v1 = vpop.f32.mrf.mxu2  ;;  %v721_v2 = vpop.f32.mrf.mxu3 }
 0x158   : > { %v801_v3 = vsel %vm788_vm7, %v721_v2, -inf }
 0x159   : > { %v742_v5 = vpop.f32.mrf.mxu1  ;;  %802 = vmax.xlane.f32.xlu0 %v801_v3 }
 0x15a   : > { %v804_v6 = vsel %vm788_vm7, %v742_v5, -inf }
 0x15b   : > { %805 = vmax.xlane.f32.xlu1 %v804_v6 }
 0x15f   : > { %v723_v8 = vpop.f32.mrf.mxu3 }
 0x161   : > { %v744_v9 = vpop.f32.mrf.mxu1 }
 0x167   : > { %v763_v11 = vpop.f32.mrf.mxu2 }
 0x168   : > { %v807_v12 = vsel %vm788_vm7, %v763_v11, -inf }
 0x169   : > { %1218 = vrot.lane.b32.xlu2 %v3448_v18, %s3195_s29  ;;  %808 = vmax.xlane.f32.xlu1 %v807_v12 }
 0x16d   : > { %1195 = vrot.lane.b32.xlu0 %v3435_v7, %s3195_s29 }
 0x16f   : > { %v765_v13 = vpop.f32.mrf.mxu2  ;;  %v784_v14 = vpop.f32.mrf.mxu3 }
 0x170   : > { %v810_v16 = vsel %vm788_vm7, %v784_v14, -inf }
 0x171   : > { %811 = vmax.xlane.f32.xlu1 %v810_v16 }
 0x175   : > { %1080 = vrot.lane.b32.xlu0 %v3366_v21, %s3195_s29 }
 0x177   : > { %v786_v17 = vpop.f32.mrf.mxu3 }
 0x18a   : > { %1057 = vrot.lane.b32.xlu1 %v3495_v20, %s3194_s4  ;;  %s2869_s4 = sshll.u32 %s3180_s9, 1 }
 0x1ac   : > { %v791_v22 = vpop.xlane.xlu2 %790 }
 0x1ad   : > { %v813_v25 = vsub.f32 %v637_v42, %v791_v22 }
 0x1af   : > { %v821_v26 = vmul.f32 1.442695, %v813_v25 }
 0x1b1   : > { %2970 = vpow2.f32 %v821_v26 }
 0x1b4   : > { %v794_v27 = vpop.xlane.xlu0 %793 }
 0x1b5   : > { %v814_v10 = vsub.f32 %v658_v49, %v794_v27 }
 0x1b7   : > { %v823_v29 = vmul.f32 1.442695, %v814_v10  ;;  %v3499_v30 = vpop.eup %2970 }
 0x1b8   : > { %v837_v31 = vsel %vm788_vm7, %v3499_v30, 0.0 }
 0x1b9   : > { %2972 = vpow2.f32 %v823_v29  ;;  %838 = vadd.xlane.f32.xlu0 %v837_v31 }
 0x1bc   : > { %v797_v23 = vpop.xlane.xlu0 %796 }
 0x1bd   : > { %v815_v35 = vsub.f32 %v679_v51, %v797_v23 }
 0x1bf   : > { %v3503_v38 = vpop.eup %2972  ;;  %v825_v40 = vmul.f32 1.442695, %v815_v35 }
 0x1c0   : > { %v840_v41 = vsel %vm788_vm7, %v3503_v38, 0.0 }
 0x1c1   : > { %2974 = vpow2.f32 %v825_v40  ;;  %841 = vadd.xlane.f32.xlu2 %v840_v41 }
 0x1c4   : > { %v800_v42 = vpop.xlane.xlu2 %799 }
 0x1c5   : > { %v816_v46 = vsub.f32 %v700_v60, %v800_v42  ;;  %v1109_v42 = vsel %vm621_vm1, %v3475_v43, 0 }
 0x1c7   : > { %v3507_v47 = vpop.eup %2974  ;;  %v827_v48 = vmul.f32 1.442695, %v816_v46 }
 0x1c8   : > { %v843_v49 = vsel %vm788_vm7, %v3507_v47, 0.0 }
 0x1c9   : > { %2976 = vpow2.f32 %v827_v48  ;;  %844 = vadd.xlane.f32.xlu0 %v843_v49  ;;  %v1132_v49 = vsel %vm621_vm1, %v3467_v33, 0 }
 0x1cc   : > { %v803_v50 = vpop.xlane.xlu0 %802  ;;  %v1219_v22 = vpop.permute.xlu2 %1218 }
 0x1cd   : > { %v817_v51 = vsub.f32 %v721_v2, %v803_v50 }
 0x1ce   : > { %v806_v53 = vpop.xlane.xlu1 %805 }
 0x1cf   : > { %v3511_v54 = vpop.eup %2976  ;;  %v829_v55 = vmul.f32 1.442695, %v817_v51  ;;  %v818_v56 = vsub.f32 %v742_v5, %v806_v53 }
 0x1d0   : > { %v846_v57 = vsel %vm788_vm7, %v3511_v54, 0.0 }
 0x1d1   : > { %2978 = vpow2.f32 %v829_v55  ;;  %v831_v59 = vmul.f32 1.442695, %v818_v56  ;;  %847 = vadd.xlane.f32.xlu0 %v846_v57 }
 0x1d3   : > { %2980 = vpow2.f32 %v831_v59 }
 0x1d7   : > { %v3515_v60 = vpop.eup %2978 }
 0x1d8   : > { %v849_v61 = vsel %vm788_vm7, %v3515_v60, 0.0 }
 0x1d9   : > { %v3519_v63 = vpop.eup %2980  ;;  %1078 = vrot.lane.b32.xlu2 %v3379_v32, %s3195_s29  ;;  %850 = vadd.xlane.f32.xlu1 %v849_v61 }
 0x1da   : > { %v852_v0 = vsel %vm788_vm7, %v3519_v63, 0.0 }
 0x1db   : > { %853 = vadd.xlane.f32.xlu0 %v852_v0 }
 0x1dc   : > { %v809_v1 = vpop.xlane.xlu1 %808 }
 0x1dd   : > { %v819_v2 = vsub.f32 %v763_v11, %v809_v1 }
 0x1df   : > { %v833_v3 = vmul.f32 1.442695, %v819_v2  ;;  %v1196_v17 = vpop.permute.xlu0 %1195 }
 0x1e0   : > { %v1201_v0 = vsel %vm621_vm1, %v1196_v17, 0 }
 0x1e1   : > { %2982 = vpow2.f32 %v833_v3 }
 0x1e4   : > { %v812_v8 = vpop.xlane.xlu1 %811 }
 0x1e5   : > { %v820_v9 = vsub.f32 %v784_v14, %v812_v8 }
 0x1e7   : > { %v3525_v5 = vpop.eup %2982  ;;  %v835_v12 = vmul.f32 1.442695, %v820_v9  ;;  %v1081_v19 = vpop.permute.xlu0 %1080 }
 0x1e8   : > { %v855_v6 = vsel %vm788_vm7, %v3525_v5, 0.0  ;;  %v1086_v31 = vsel %vm621_vm1, %v1081_v19, 0 }
 0x1e9   : > { %856 = vadd.xlane.f32.xlu0 %v855_v6  ;;  %2984 = vpow2.f32 %v835_v12 }
 0x1ef   : > { %v3536_v16 = vpop.eup %2984 }
 0x1f0   : > { %v858_v14 = vsel %vm788_vm7, %v3536_v16, 0.0 }
 0x1f2   : > { %1149 = vrot.lane.b32.xlu1 %v3408_v52, %s3195_s29 }
 0x1fa   : > { %1172 = vrot.lane.b32.xlu1 %v3425_v62, %s3195_s29 }
 0x1fc   : > { %v1058_v13 = vpop.permute.xlu1 %1057 }
 0x1fd   : > { %v1063_v11 = vsel %vm893_vm6, %v1058_v13, 0  ;;  %1193 = vrot.lane.b32.xlu0 %v3443_v15, %s3195_s29 }
 0x1fe   : > { %1072 = vmatpush.bf16.msra.mxu0 %v1063_v11 }
 0x202   : > { %1239 = vrot.lane.b32.xlu1 %v3461_v28, %s3195_s29  ;;  %859 = vadd.xlane.f32.xlu2 %v858_v14 }
 0x205   : > { %1216 = vrot.lane.b32.xlu0 %v3455_v24, %s3195_s29 }
 0x20a   : > { %1400 = vrot.lane.b32.xlu1 %v3398_v45, %s3196_s15 }
 0x20d   : > { %1147 = vrot.lane.b32.xlu0 %v3420_v58, %s3195_s29 }
 0x212   : > { %1463 = vrot.lane.b32.xlu1 %v3435_v7, %s3196_s15 }
 0x215   : > { %1170 = vrot.lane.b32.xlu0 %v3430_v4, %s3195_s29 }
 0x21a   : > { %1484 = vrot.lane.b32.xlu1 %v3448_v18, %s3196_s15  ;;  %1241 = vrot.lane.b32.xlu2 %v3495_v20, %s3195_s29  ;;  %s2578_s29 = sadd.s32 %s3176_s30, %s2869_s4 }
 0x21d   : > { %1379 = vrot.lane.b32.xlu0 %v3384_v36, %s3196_s15 }
 0x222   : > { %1421 = vrot.lane.b32.xlu1 %v3408_v52, %s3196_s15  ;;  %1358 = vrot.lane.b32.xlu2 %v3366_v21, %s3196_s15 }
 0x225   : > { %1551 = vrot.lane.b32.xlu0 %v3384_v36, %s3197_s16 }
 0x22a   : > { %1505 = vrot.lane.b32.xlu1 %v3495_v20, %s3196_s15  ;;  %1549 = vrot.lane.b32.xlu2 %v3386_v37, %s3197_s16 }
 0x22c   : > { %v839_v25 = vpop.xlane.xlu0 %838 }
 0x22d   : > { %1574 = vrot.lane.b32.xlu0 %v3398_v45, %s3197_s16  ;;  %2986 = vrcp.f32 %v839_v25 }
 0x233   : > { %v2987_v27 = vpop.eup %2986 }
 0x234   : > { %v842_v26 = vpop.xlane.xlu2 %841  ;;  %v869_v10 = vmul.f32 %v2987_v27, %v3499_v30 }
 0x235   : > { %2988 = vrcp.f32 %v842_v26  ;;  %1442 = vrot.lane.b32.xlu0 %v3425_v62, %s3196_s15  ;;  %s412_s15 = sand.u32 1, %s3168_s28  }
 0x236   : > { %v877_v29 = vpack.c.bf16 %v869_v10, %v869_v10  ;;  %s2568_s30 = scalar_lea.sflag [#allocation3], %s412_s15 }
 0x238   : > { %2803 = vmatmul.msk.bf16.vlgmr.msrb.gmra.mxu1 %vm621_vm1, %v877_v29 }
 0x239   : > { %1095 = vmatpush.bf16.xpose.msrb.mxu1 %v1086_v31 }
 0x23b   : > { %v2989_v23 = vpop.eup %2988 }
 0x23c   : > { %v870_v35 = vmul.f32 %v2989_v23, %v3503_v38  ;;  %v845_v40 = vpop.xlane.xlu0 %844  ;;  %v1079_v8 = vpop.permute.xlu2 %1078 }
 0x23d   : > { %2990 = vrcp.f32 %v845_v40  ;;  %1572 = vrot.lane.b32.xlu0 %v3396_v44, %s3197_s16 }
 0x23e   : > { %v878_v41 = vpack.c.bf16 %v870_v35, %v870_v35 }
 0x240   : > { %2804 = vmatmul.msk.bf16.vlgmr.msrb.gmra.mxu2 %vm621_vm1, %v878_v41 }
 0x241   : > { %1118 = vmatpush.bf16.xpose.msrb.mxu2 %v1109_v42 }
 0x243   : > { %v2991_v30 = vpop.eup %2990 }
 0x244   : > { %v871_v46 = vmul.f32 %v2991_v30, %v3507_v47  ;;  %v848_v48 = vpop.xlane.xlu0 %847 }
 0x245   : > { %2992 = vrcp.f32 %v848_v48  ;;  %1643 = vrot.lane.b32.xlu0 %v3435_v7, %s3197_s16 }
 0x246   : > { %v879_v38 = vpack.c.bf16 %v871_v46, %v871_v46 }
 0x248   : > { %2805 = vmatmul.msk.bf16.vlgmr.msrb.gmra.mxu3 %vm621_vm1, %v879_v38 }
 0x249   : > { %1141 = vmatpush.bf16.xpose.msrb.mxu3 %v1132_v49 }
 0x24b   : > { %v2993_v50 = vpop.eup %2992 }
 0x24c   : > { %v872_v43 = vmul.f32 %v2993_v50, %v3511_v54  ;;  %v851_v51 = vpop.xlane.xlu1 %850 }
 0x24d   : > { %2994 = vrcp.f32 %v851_v51 }
 0x24e   : > { %v854_v53 = vpop.xlane.xlu0 %853  ;;  %v880_v55 = vpack.c.bf16 %v872_v43, %v872_v43 }
 0x24f   : > { %2996 = vrcp.f32 %v854_v53 }
 0x250   : > { %2806 = vmatmul.msk.bf16.vlgmr.msrb.gmra.mxu0 %vm621_vm1, %v880_v55 }
 0x253   : > { %v2995_v47 = vpop.eup %2994 }
 0x254   : > { %v873_v56 = vmul.f32 %v2995_v47, %v3515_v60 }
 0x255   : > { %v2997_v57 = vpop.eup %2996 }
 0x256   : > { %v881_v59 = vpack.c.bf16 %v873_v56, %v873_v56  ;;  %v874_v33 = vmul.f32 %v2997_v57, %v3519_v63  ;;  %v1224_v63 = vsel %vm621_vm1, %v1219_v22, 0 }
 0x258   : > { %v882_v61 = vpack.c.bf16 %v874_v33, %v874_v33  ;;  %2807 = vmatmul.msk.bf16.vlgmr.msra.gmra.mxu1 %vm621_vm1, %v881_v59 }
 0x25a   : > { %2808 = vmatmul.msk.bf16.vlgmr.msra.gmra.mxu2 %vm621_vm1, %v882_v61 }
 0x25b   : > { %1210 = vmatpush.bf16.xpose.msra.mxu2 %v1201_v0 }
 0x25c   : > { %v857_v54 = vpop.xlane.xlu0 %856 }
 0x25d   : > { %2998 = vrcp.f32 %v857_v54 }
 0x263   : > { %v2999_v1 = vpop.eup %2998 }
 0x264   : > { %v875_v2 = vmul.f32 %v2999_v1, %v3525_v5  ;;  %v1150_v3 = vpop.permute.xlu1 %1149 }
 0x265   : > { %v1155_v60 = vsel %vm621_vm1, %v1150_v3, 0 }
 0x266   : > { %v883_v6 = vpack.c.bf16 %v875_v2, %v875_v2  ;;  %1164 = vmatpush.bf16.xpose.msrb.mxu0 %v1155_v60 }
 0x268   : > { %2809 = vmatmul.msk.bf16.vlgmr.msra.gmra.mxu3 %vm621_vm1, %v883_v6  ;;  %2811 = vmatmul.msk.bf16.vlgmr.msrb.gmra.mxu1 %vm621_vm1, %v1079_v8 }
 0x269   : > { %1233 = vmatpush.bf16.xpose.msra.mxu3 %v1224_v63 }
 0x26a   : > { %2812 = vmatmul.msk.bf16.vlgmr.msrb.gmra.mxu2 %vm621_vm1, %v3469_v34 }
 0x26c   : > { %v1173_v9 = vpop.permute.xlu1 %1172 }
 0x26d   : > { %v1178_v12 = vsel %vm621_vm1, %v1173_v9, 0 }
 0x26e   : > { %1187 = vmatpush.bf16.xpose.msra.mxu1 %v1178_v12 }
 0x26f   : > { %v1194_v5 = vpop.permute.xlu0 %1193 }
 0x274   : > { %v1240_v13 = vpop.permute.xlu1 %1239 }
 0x275   : > { %v860_v11 = vpop.xlane.xlu2 %859 }
 0x276   : > { %3000 = vrcp.f32 %v860_v11 }
 0x277   : > { %v1217_v14 = vpop.permute.xlu0 %1216 }
 0x278   : > { %2813 = vmatmul.msk.bf16.vlgmr.msrb.gmra.mxu3 %vm621_vm1, %v3472_v39 }
 0x27a   : > { %2816 = vmatmul.msk.bf16.vlgmr.msra.gmra.mxu2 %vm621_vm1, %v1194_v5 }
 0x27c   : > { %v3001_v17 = vpop.eup %3000  ;;  %v1401_v19 = vpop.permute.xlu1 %1400 }
 0x27d   : > { %v876_v22 = vmul.f32 %v3001_v17, %v3536_v16  ;;  %v1406_v34 = vsel %vm893_vm6, %v1401_v19, 0  ;;  %v1242_v25 = vpop.permute.xlu2 %1241 }
 0x27e   : > { %1415 = vmatpush.bf16.msrb.mxu3 %v1406_v34  ;;  %v1247_v10 = vsel %vm621_vm1, %v1242_v25, 0 }
 0x27f   : > { %v884_v26 = vpack.c.bf16 %v876_v22, %v876_v22  ;;  %v1148_v27 = vpop.permute.xlu0 %1147 }
 0x281   : > { %2810 = vmatmul.msk.bf16.vlgmr.msra.gmra.mxu0 %vm621_vm1, %v884_v26 }
 0x282   : > { %1256 = vmatpush.bf16.xpose.msra.mxu0 %v1247_v10 }
 0x284   : > { %v1464_v29 = vpop.permute.xlu1 %1463 }
 0x285   : > { %v1359_v31 = vpop.permute.xlu2 %1358  ;;  %v1469_v42 = vsel %vm893_vm6, %v1464_v29, 0 }
 0x286   : > { %v1364_v39 = vsel %vm893_vm6, %v1359_v31, 0 }
 0x287   : > { %v1171_v23 = vpop.permute.xlu0 %1170  ;;  %1373 = vmatpush.bf16.msrb.mxu1 %v1364_v39 }
 0x288   : > { %2815 = vmatmul.msk.bf16.vlgmr.msra.gmra.mxu1 %vm621_vm1, %v1171_v23  ;;  %2817 = vmatmul.msk.bf16.vlgmr.msra.gmra.mxu3 %vm621_vm1, %v1217_v14 }
 0x28c   : > { %v1485_v16 = vpop.permute.xlu1 %1484 }
 0x28d   : > { %v1490_v35 = vsel %vm893_vm6, %v1485_v16, 0 }
 0x28e   : > { %1499 = vmatpush.bf16.msra.mxu3 %v1490_v35 }
 0x28f   : > { %v1380_v40 = vpop.permute.xlu0 %1379 }
 0x290   : > { %v1385_v41 = vsel %vm893_vm6, %v1380_v40, 0 }
 0x291   : > { %2814 = vmatmul.msk.bf16.vlgmr.msrb.gmra.mxu0 %vm621_vm1, %v1148_v27  ;;  %1394 = vmatpush.bf16.msrb.mxu2 %v1385_v41 }
 0x294   : > { %v1422_v30 = vpop.permute.xlu1 %1421 }
 0x295   : > { %1478 = vmatpush.bf16.msra.mxu2 %v1469_v42  ;;  %v1427_v46 = vsel %vm893_vm6, %v1422_v30, 0 }
 0x296   : > { %1436 = vmatpush.bf16.msrb.mxu0 %v1427_v46 }
 0x297   : > { %v3609_v48 = vpop.permute.xlu0 %1551 }
 0x29c   : > { %v1506_v38 = vpop.permute.xlu1 %1505 }
 0x29d   : > { %v1511_v50 = vsel %vm893_vm6, %v1506_v38, 0 }
 0x29f   : > { %v3611_v49 = vpop.permute.xlu0 %1574 }
 0x2a1   : > { %2818 = vmatmul.msk.bf16.vlgmr.msra.gmra.mxu0 %vm621_vm1, %v1240_v13 }
 0x2a2   : > { %1520 = vmatpush.bf16.msra.mxu0 %v1511_v50 }
 0x2a7   : > { %v1443_v43 = vpop.permute.xlu0 %1442 }
 0x2a8   : > { %v1448_v51 = vsel %vm893_vm6, %v1443_v43, 0 }
 0x2a9   : > { %1457 = vmatpush.bf16.msra.mxu1 %v1448_v51 }
 0x2b5   : > { %v906_v53 = vpop.f32.mrf.mxu1 }
 0x2bd   : > { %v908_v55 = vpop.f32.mrf.mxu1 }
 0x2c3   : > { %v930_v47 = vpop.f32.mrf.mxu2 }
 0x2c4   : > { %v2430_v56 = vrot.slane %v930_v47, 7 }
 0x2c6   : > { %v2431_v57 = vsel %vm599_vm3, %v2430_v56, %v906_v53 }
 0x2cb   : > { %v932_v59 = vpop.f32.mrf.mxu2  ;;  %v954_v33 = vpop.f32.mrf.mxu3 }
 0x2cc   : > { %v2432_v61 = vrot.slane %v954_v33, 6 }
 0x2cd   : > { %v978_v0 = vpop.f32.mrf.mxu0 }
 0x2ce   : > { %v2433_v54 = vsel %vm603_vm4, %v2432_v61, %v2431_v57  ;;  %v2434_v1 = vrot.slane %v978_v0, 5  ;;  %v3638_v0 = vpop.permute.xlu2 %1549 }
 0x2d0   : > { %v2435_v2 = vsel %vm607_vm5, %v2434_v1, %v2433_v54 }
 0x2d3   : > { %v956_v3 = vpop.f32.mrf.mxu3 }
 0x2d5   : > { %v980_v60 = vpop.f32.mrf.mxu0  ;;  %v1002_v6 = vpop.f32.mrf.mxu1 }
 0x2d6   : > { %v2436_v8 = vrot.slane %v1002_v6, 4 }
 0x2d8   : > { %v2438_v63 = vsel %vm2437_vm8, %v2436_v8, %v2435_v2 }
 0x2dd   : > { %v1004_v9 = vpop.f32.mrf.mxu1  ;;  %v1026_v12 = vpop.f32.mrf.mxu2 }
 0x2de   : > { %v2439_v5 = vrot.slane %v1026_v12, 3 }
 0x2e0   : > { %v2441_v13 = vsel %vm2440_vm9, %v2439_v5, %v2438_v63  ;;  %v3642_v63 = vpop.permute.xlu0 %1572 }
 0x2e5   : > { %v1028_v11 = vpop.f32.mrf.mxu2  ;;  %v1097_v14 = vpop.f32.mrf.mxu1 }
 0x2e6   : > { %v1262_v17 = vsel %vm788_vm7, %v1097_v14, -inf }
 0x2e7   : > { %1263 = vmax.xlane.f32.xlu2 %v1262_v17 }
 0x2eb   : > { %v1050_v19 = vpop.f32.mrf.mxu3 }
 0x2ec   : > { %v2442_v22 = vrot.slane %v1050_v19, 2 }
 0x2ed   : > { %v1099_v34 = vpop.f32.mrf.mxu1  ;;  %v1120_v25 = vpop.f32.mrf.mxu2 }
 0x2ee   : > { %v2444_v26 = vsel %vm2443_vm10, %v2442_v22, %v2441_v13  ;;  %v1265_v27 = vsel %vm788_vm7, %v1120_v25, -inf  ;;  %v3650_v13 = vpop.permute.xlu0 %1643 }
 0x2ef   : > { %1266 = vmax.xlane.f32.xlu2 %v1265_v27 }
 0x2f3   : > { %v1052_v10 = vpop.f32.mrf.mxu3 }
 0x2f5   : > { %v1122_v29 = vpop.f32.mrf.mxu2 }
 0x2fb   : > { %v1143_v31 = vpop.f32.mrf.mxu3 }
 0x2fc   : > { %v1268_v39 = vsel %vm788_vm7, %v1143_v31, -inf }
 0x2fd   : > { %1269 = vmax.xlane.f32.xlu0 %v1268_v39  ;;  %v1212_v23 = vpop.f32.mrf.mxu2 }
 0x2fe   : > { %v1074_v16 = vpop.f32.mrf.mxu0  ;;  %v1277_v35 = vsel %vm788_vm7, %v1212_v23, -inf }
 0x2ff   : > { %v2445_v40 = vrot.slane %v1074_v16, 1  ;;  %1278 = vmax.xlane.f32.xlu1 %v1277_v35 }
 0x301   : > { %v3627_v41 = vsel %vm2446_vm11, %v2445_v40, %v2444_v26 }
 0x303   : > { %v1145_v42 = vpop.f32.mrf.mxu3 }
 0x305   : > { %v1189_v30 = vpop.f32.mrf.mxu1  ;;  %v1214_v46 = vpop.f32.mrf.mxu2 }
 0x306   : > { %v1076_v38 = vpop.f32.mrf.mxu0  ;;  %v1274_v50 = vsel %vm788_vm7, %v1189_v30, -inf }
 0x307   : > { %1275 = vmax.xlane.f32.xlu2 %v1274_v50 }
 0x30b   : > { %v1235_v43 = vpop.f32.mrf.mxu3 }
 0x30c   : > { %v1280_v51 = vsel %vm788_vm7, %v1235_v43, -inf }
 0x30d   : > { %1281 = vmax.xlane.f32.xlu0 %v1280_v51  ;;  %v1191_v53 = vpop.f32.mrf.mxu1 }
 0x30e   : > { %v1166_v55 = vpop.f32.mrf.mxu0 }
 0x30f   : > { %v1271_v47 = vsel %vm788_vm7, %v1166_v55, -inf }
 0x310   : > { %1272 = vmax.xlane.f32.xlu1 %v1271_v47 }
 0x313   : > { %v1237_v56 = vpop.f32.mrf.mxu3 }
 0x316   : > { %v1168_v57 = vpop.f32.mrf.mxu0 }
 0x31e   : > { %v3632_v59 = vpop.f32.mrf.mxu0 }
 0x31f   : > { %v1283_v33 = vsel %vm788_vm7, %v3632_v59, -inf }
 0x320   : > { %1284 = vmax.xlane.f32.xlu0 %v1283_v33 }
 0x326   : > { %v1260_v61 = vpop.f32.mrf.mxu0 }
 0x334   : > { %1528 = vrot.lane.b32.xlu0 %v3366_v21, %s3197_s16 }
 0x35a   : > { %v1264_v54 = vpop.xlane.xlu2 %1263 }
 0x35b   : > { %v1286_v1 = vsub.f32 %v1097_v14, %v1264_v54 }
 0x35d   : > { %v1294_v2 = vmul.f32 1.442695, %v1286_v1 }
 0x35f   : > { %3002 = vpow2.f32 %v1294_v2 }
 0x362   : > { %v1267_v3 = vpop.xlane.xlu2 %1266 }
 0x363   : > { %v1287_v60 = vsub.f32 %v1120_v25, %v1267_v3 }
 0x365   : > { %v3640_v6 = vpop.eup %3002  ;;  %v1296_v8 = vmul.f32 1.442695, %v1287_v60 }
 0x366   : > { %v1310_v9 = vsel %vm788_vm7, %v3640_v6, 0.0 }
 0x367   : > { %3004 = vpow2.f32 %v1296_v8  ;;  %1311 = vadd.xlane.f32.xlu2 %v1310_v9  ;;  %v1557_v8 = vsel %vm621_vm1, %v3609_v48, 0 }
 0x36d   : > { %v3646_v12 = vpop.eup %3004 }
 0x36e   : > { %v1313_v5 = vsel %vm788_vm7, %v3646_v12, 0.0 }
 0x36f   : > { %1314 = vadd.xlane.f32.xlu1 %v1313_v5 }
 0x370   : > { %v1270_v11 = vpop.xlane.xlu0 %1269 }
 0x371   : > { %v1288_v25 = vsub.f32 %v1143_v31, %v1270_v11 }
 0x372   : > { %v1279_v27 = vpop.xlane.xlu1 %1278 }
 0x373   : > { %v1298_v26 = vmul.f32 1.442695, %v1288_v25  ;;  %v1291_v29 = vsub.f32 %v1212_v23, %v1279_v27 }
 0x375   : > { %v1304_v16 = vmul.f32 1.442695, %v1291_v29 }
 0x37a   : > { %v1276_v10 = vpop.xlane.xlu2 %1275 }
 0x37b   : > { %v1290_v39 = vsub.f32 %v1189_v30, %v1276_v10 }
 0x37d   : > { %v1302_v42 = vmul.f32 1.442695, %v1290_v39 }
 0x37f   : > { %1597 = vrot.lane.b32.xlu2 %v3408_v52, %s3197_s16 }
 0x380   : > { %v1282_v14 = vpop.xlane.xlu0 %1281 }
 0x381   : > { %v1292_v17 = vsub.f32 %v1235_v43, %v1282_v14 }
 0x383   : > { %v1306_v19 = vmul.f32 1.442695, %v1292_v17  ;;  %v1273_v35 = vpop.xlane.xlu1 %1272 }
 0x384   : > { %v1289_v46 = vsub.f32 %v1166_v55, %v1273_v35 }
 0x385   : > { %3006 = vpow2.f32 %v1306_v19 }
 0x386   : > { %3008 = vpow2.f32 %v1298_v26  ;;  %v1300_v31 = vmul.f32 1.442695, %v1289_v46  ;;  %v1580_v26 = vsel %vm621_vm1, %v3611_v49, 0  ;;  %v1649_v46 = vsel %vm621_vm1, %v3650_v13, 0 }
 0x387   : > { %3010 = vpow2.f32 %v1304_v16 }
 0x388   : > { %1666 = vrot.lane.b32.xlu1 %v3448_v18, %s3197_s16  ;;  %3012 = vpow2.f32 %v1302_v42 }
 0x389   : > { %3014 = vpow2.f32 %v1300_v31 }
 0x38b   : > { %v3656_v22 = vpop.eup %3006 }
 0x38c   : > { %v1328_v34 = vsel %vm788_vm7, %v3656_v22, 0.0  ;;  %v3662_v40 = vpop.eup %3008 }
 0x38d   : > { %1329 = vadd.xlane.f32.xlu0 %v1328_v34  ;;  %v1316_v38 = vsel %vm788_vm7, %v3662_v40, 0.0  ;;  %v3668_v23 = vpop.eup %3010 }
 0x38e   : > { %v3670_v30 = vpop.eup %3012  ;;  %v1325_v50 = vsel %vm788_vm7, %v3668_v23, 0.0 }
 0x38f   : > { %v1322_v43 = vsel %vm788_vm7, %v3670_v30, 0.0  ;;  %v3678_v51 = vpop.eup %3014 }
 0x390   : > { %v1319_v53 = vsel %vm788_vm7, %v3678_v51, 0.0 }
 0x393   : > { %v1285_v47 = vpop.xlane.xlu0 %1284 }
 0x394   : > { %v1293_v1 = vsub.f32 %v3632_v59, %v1285_v47 }
 0x396   : > { %v1308_v60 = vmul.f32 1.442695, %v1293_v1 }
 0x3a1   : > { %1641 = vrot.lane.b32.xlu0 %v3443_v15, %s3197_s16 }
 0x3a6   : > { %v1529_v61 = vpop.permute.xlu0 %1528 }
 0x3a8   : > { %1317 = vadd.xlane.f32.xlu2 %v1316_v38 }
 0x3a9   : > { %1595 = vrot.lane.b32.xlu0 %v3420_v58, %s3197_s16 }
 0x3b0   : > { %1326 = vadd.xlane.f32.xlu2 %v1325_v50 }
 0x3b1   : > { %1618 = vrot.lane.b32.xlu0 %v3430_v4, %s3197_s16 }
 0x3b2   : > { %1323 = vadd.xlane.f32.xlu1 %v1322_v43 }
 0x3b8   : > { %1320 = vadd.xlane.f32.xlu2 %v1319_v53 }
 0x3b9   : > { %1827 = vrot.lane.b32.xlu0 %v3384_v36, %s3198_s19 }
 0x3c1   : > { %1890 = vrot.lane.b32.xlu0 %v3425_v62, %s3198_s19 }
 0x3c9   : > { %1999 = vrot.lane.b32.xlu0 %v3384_v36, %s3199_s23 }
 0x3cb   : > { %1526 = vrot.lane.b32.xlu1 %v3379_v32, %s3197_s16 }
 0x3d0   : > { %1664 = vrot.lane.b32.xlu2 %v3455_v24, %s3197_s16 }
 0x3d1   : > { %2022 = vrot.lane.b32.xlu0 %v3398_v45, %s3199_s23 }
 0x3d3   : > { %1620 = vrot.lane.b32.xlu1 %v3425_v62, %s3197_s16 }
 0x3d9   : > { %2020 = vrot.lane.b32.xlu0 %v3396_v44, %s3199_s23  ;;  %v1534_v44 = vsel %vm621_vm1, %v1529_v61, 0 }
 0x3da   : > { %v1312_v55 = vpop.xlane.xlu2 %1311 }
 0x3db   : > { %3016 = vrcp.f32 %v1312_v55  ;;  %1687 = vrot.lane.b32.xlu1 %v3461_v28, %s3197_s16 }
 0x3e1   : > { %v3017_v56 = vpop.eup %3016  ;;  %1976 = vrot.lane.b32.xlu0 %v3366_v21, %s3199_s23 }
 0x3e2   : > { %v1342_v57 = vmul.f32 %v3017_v56, %v3640_v6  ;;  %v1315_v33 = vpop.xlane.xlu1 %1314  ;;  %v1598_v48 = vpop.permute.xlu2 %1597 }
 0x3e3   : > { %3018 = vrcp.f32 %v1315_v33  ;;  %1848 = vrot.lane.b32.xlu1 %v3398_v45, %s3198_s19 }
 0x3e4   : > { %v1350_v54 = vpack.c.bf16 %v1342_v57, %v1342_v57  ;;  %3020 = vpow2.f32 %v1308_v60 }
 0x3e6   : > { %2819 = vmatmul.msk.bf16.vlgmr.msrb.gmra.mxu1 %vm621_vm1, %v1350_v54 }
 0x3e7   : > { %1543 = vmatpush.bf16.xpose.msrb.mxu1 %v1534_v44 }
 0x3e9   : > { %v3019_v2 = vpop.eup %3018 }
 0x3ea   : > { %v1343_v3 = vmul.f32 %v3019_v2, %v3646_v12  ;;  %v3716_v59 = vpop.eup %3020 }
 0x3eb   : > { %1869 = vrot.lane.b32.xlu1 %v3408_v52, %s3198_s19  ;;  %v1331_v9 = vsel %vm788_vm7, %v3716_v59, 0.0 }
 0x3ec   : > { %v1351_v6 = vpack.c.bf16 %v1343_v3, %v1343_v3 }
 0x3ee   : > { %2820 = vmatmul.msk.bf16.vlgmr.msrb.gmra.mxu2 %vm621_vm1, %v1351_v6 }
 0x3ef   : > { %1566 = vmatpush.bf16.xpose.msrb.mxu2 %v1557_v8 }
 0x3f3   : > { %1911 = vrot.lane.b32.xlu1 %v3435_v7, %s3198_s19 }
 0x3f9   : > { %1332 = vadd.xlane.f32.xlu2 %v1331_v9 }
 0x3fa   : > { %v1667_v11 = vpop.permute.xlu1 %1666 }
 0x3fb   : > { %1932 = vrot.lane.b32.xlu1 %v3448_v18, %s3198_s19  ;;  %v1672_v55 = vsel %vm621_vm1, %v1667_v11, 0 }
 0x400   : > { %v1330_v12 = vpop.xlane.xlu0 %1329 }
 0x403   : > { %1997 = vrot.lane.b32.xlu1 %v3386_v37, %s3199_s23 }
 0x411   : > { %1689 = vrot.lane.b32.xlu2 %v3495_v20, %s3197_s16  ;;  %s2870_s16 = sshll.u32 %s2578_s29, 3 }
 0x413   : > { %v1642_v14 = vpop.permute.xlu0 %1641 }
 0x419   : > { %1806 = vrot.lane.b32.xlu2 %v3366_v21, %s3198_s19 }
 0x41b   : > { %v1318_v5 = vpop.xlane.xlu2 %1317  ;;  %v3734_v27 = vpop.permute.xlu0 %1595 }
 0x41c   : > { %3022 = vrcp.f32 %v1318_v5 }
 0x421   : > { %1953 = vrot.lane.b32.xlu2 %v3495_v20, %s3198_s19  ;;  %s2743_s19 = sshll.u32 %s412_s15, 3 }
 0x422   : > { %v3023_v17 = vpop.eup %3022  ;;  %s414_s21 = scalar_lea.vmem [#allocation2], %s2743_s19 }
 0x423   : > { %v1344_v19 = vmul.f32 %v3023_v17, %v3662_v40  ;;  %v1327_v34 = vpop.xlane.xlu2 %1326  ;;  %s2582_s22 = sshll.u32 %s414_s21, 4  ;;  %s2583_s22 = int_to_ptr.vmem [resolvable:$true] %s2582_s22 }
 0x424   : > { %3024 = vrcp.f32 %v1327_v34 }
 0x425   : > { %v1352_v37 = vpack.c.bf16 %v1344_v19, %v1344_v19  ;;  %v1324_v25 = vpop.xlane.xlu1 %1323 }
 0x426   : > { %3026 = vrcp.f32 %v1324_v25 }
 0x427   : > { %2821 = vmatmul.msk.bf16.vlgmr.msrb.gmra.mxu3 %vm621_vm1, %v1352_v37  ;;  %3028 = vrcp.f32 %v1330_v12 }
 0x428   : > { %1589 = vmatpush.bf16.xpose.msrb.mxu3 %v1580_v26 }
 0x42a   : > { %v3025_v10 = vpop.eup %3024 }
 0x42b   : > { %v1347_v29 = vmul.f32 %v3025_v10, %v3668_v23  ;;  %v1321_v39 = vpop.xlane.xlu2 %1320  ;;  %v1619_v23 = vpop.permute.xlu0 %1618 }
 0x42c   : > { %v3027_v16 = vpop.eup %3026  ;;  %3030 = vrcp.f32 %v1321_v39 }
 0x42d   : > { %v1355_v35 = vpack.c.bf16 %v1347_v29, %v1347_v29  ;;  %v1346_v40 = vmul.f32 %v3027_v16, %v3670_v30  ;;  %v3029_v42 = vpop.eup %3028  ;;  %v1603_v30 = vsel %vm621_vm1, %v1598_v48, 0 }
 0x42e   : > { %v1348_v38 = vmul.f32 %v3029_v42, %v3656_v22 }
 0x42f   : > { %v1354_v49 = vpack.c.bf16 %v1346_v40, %v1346_v40  ;;  %2824 = vmatmul.msk.bf16.vlgmr.msra.gmra.mxu2 %vm621_vm1, %v1355_v35 }
 0x430   : > { %1658 = vmatpush.bf16.xpose.msra.mxu2 %v1649_v46  ;;  %v1356_v43 = vpack.c.bf16 %v1348_v38, %v1348_v38 }
 0x431   : > { %2823 = vmatmul.msk.bf16.vlgmr.msra.gmra.mxu1 %vm621_vm1, %v1354_v49 }
 0x432   : > { %v3031_v31 = vpop.eup %3030 }
 0x433   : > { %v1345_v50 = vmul.f32 %v3031_v31, %v3678_v51  ;;  %v1828_v13 = vpop.permute.xlu0 %1827  ;;  %v1665_v61 = vpop.permute.xlu2 %1664 }
 0x434   : > { %v1833_v47 = vsel %vm893_vm6, %v1828_v13, 0 }
 0x435   : > { %v1353_v53 = vpack.c.bf16 %v1345_v50, %v1345_v50 }
 0x437   : > { %2822 = vmatmul.msk.bf16.vlgmr.msrb.gmra.mxu0 %vm621_vm1, %v1353_v53  ;;  %2825 = vmatmul.msk.bf16.vlgmr.msra.gmra.mxu3 %vm621_vm1, %v1356_v43 }
 0x438   : > { %1612 = vmatpush.bf16.xpose.msrb.mxu0 %v1603_v30  ;;  %1681 = vmatpush.bf16.xpose.msra.mxu3 %v1672_v55 }
 0x43b   : > { %v1891_v34 = vpop.permute.xlu0 %1890 }
 0x43c   : > { %v1896_v26 = vsel %vm893_vm6, %v1891_v34, 0 }
 0x43d   : > { %v1527_v22 = vpop.permute.xlu1 %1526 }
 0x43f   : > { %2828 = vmatmul.msk.bf16.vlgmr.msrb.gmra.mxu2 %vm621_vm1, %v3638_v0 }
 0x440   : > { %1842 = vmatpush.bf16.msrb.mxu2 %v1833_v47 }
 0x441   : > { %2827 = vmatmul.msk.bf16.vlgmr.msrb.gmra.mxu1 %vm621_vm1, %v1527_v22 }
 0x445   : > { %v1621_v51 = vpop.permute.xlu1 %1620 }
 0x446   : > { %v1626_v56 = vsel %vm621_vm1, %v1621_v51, 0 }
 0x447   : > { %2829 = vmatmul.msk.bf16.vlgmr.msrb.gmra.mxu3 %vm621_vm1, %v3642_v63  ;;  %1635 = vmatpush.bf16.xpose.msra.mxu1 %v1626_v56 }
 0x44d   : > { %v1688_v57 = vpop.permute.xlu1 %1687 }
 0x44f   : > { %2832 = vmatmul.msk.bf16.vlgmr.msra.gmra.mxu2 %vm621_vm1, %v1642_v14 }
 0x451   : > { %2831 = vmatmul.msk.bf16.vlgmr.msra.gmra.mxu1 %vm621_vm1, %v1619_v23 }
 0x455   : > { %v1849_v33 = vpop.permute.xlu1 %1848 }
 0x456   : > { %v1854_v54 = vsel %vm893_vm6, %v1849_v33, 0 }
 0x457   : > { %2833 = vmatmul.msk.bf16.vlgmr.msra.gmra.mxu3 %vm621_vm1, %v1665_v61 }
 0x458   : > { %1863 = vmatpush.bf16.msrb.mxu3 %v1854_v54 }
 0x45d   : > { %v1870_v0 = vpop.permute.xlu1 %1869 }
 0x463   : > { %v1375_v44 = vpop.f32.mrf.mxu1 }
 0x465   : > { %v1912_v1 = vpop.permute.xlu1 %1911 }
 0x466   : > { %v1917_v2 = vsel %vm893_vm6, %v1912_v1, 0 }
 0x467   : > { %1926 = vmatpush.bf16.msra.mxu2 %v1917_v2 }
 0x46b   : > { %v1377_v63 = vpop.f32.mrf.mxu1 }
 0x46c   : > { %v1333_v3 = vpop.xlane.xlu2 %1332 }
 0x46d   : > { %3032 = vrcp.f32 %v1333_v3  ;;  %v1933_v60 = vpop.permute.xlu1 %1932 }
 0x46e   : > { %v1938_v6 = vsel %vm893_vm6, %v1933_v60, 0 }
 0x46f   : > { %1947 = vmatpush.bf16.msra.mxu3 %v1938_v6 }
 0x471   : > { %v1396_v8 = vpop.f32.mrf.mxu2 }
 0x472   : > { %v2457_v9 = vrot.slane %v1396_v8, 7 }
 0x473   : > { %v3033_v48 = vpop.eup %3032 }
 0x474   : > { %v1349_v12 = vmul.f32 %v3033_v48, %v3716_v59  ;;  %v2458_v5 = vsel %vm599_vm3, %v2457_v9, %v1375_v44  ;;  %v1690_v11 = vpop.permute.xlu2 %1689  ;;  %v1875_v59 = vsel %vm893_vm6, %v1870_v0, 0 }
 0x475   : > { %v1695_v17 = vsel %vm621_vm1, %v1690_v11, 0 }
 0x476   : > { %v1357_v14 = vpack.c.bf16 %v1349_v12, %v1349_v12 }
 0x478   : > { %2826 = vmatmul.msk.bf16.vlgmr.msra.gmra.mxu0 %vm621_vm1, %v1357_v14 }
 0x479   : > { %1704 = vmatpush.bf16.xpose.msra.mxu0 %v1695_v17  ;;  %v1398_v19 = vpop.f32.mrf.mxu2 }
 0x47c   : > { %v1807_v37 = vpop.permute.xlu2 %1806 }
 0x47d   : > { %v1812_v25 = vsel %vm893_vm6, %v1807_v37, 0 }
 0x47e   : > { %1821 = vmatpush.bf16.msrb.mxu1 %v1812_v25 }
 0x482   : > { %1905 = vmatpush.bf16.msra.mxu1 %v1896_v26 }
 0x484   : > { %v1954_v10 = vpop.permute.xlu2 %1953 }
 0x485   : > { %v1959_v29 = vsel %vm893_vm6, %v1954_v10, 0 }
 0x488   : > { %2830 = vmatmul.msk.bf16.vlgmr.msrb.gmra.mxu0 %vm621_vm1, %v3734_v27 }
 0x489   : > { %1884 = vmatpush.bf16.msrb.mxu0 %v1875_v59 }
 0x498   : > { %2834 = vmatmul.msk.bf16.vlgmr.msra.gmra.mxu0 %vm621_vm1, %v1688_v57 }
 0x499   : > { %1968 = vmatpush.bf16.msra.mxu0 %v1959_v29  ;;  %v3794_v29 = vpop.permute.xlu1 %1997 }
 0x4aa   : > { %v1417_v39 = vpop.f32.mrf.mxu3 }
 0x4ab   : > { %v2459_v16 = vrot.slane %v1417_v39, 6 }
 0x4ad   : > { %v2460_v35 = vsel %vm603_vm4, %v2459_v16, %v2458_v5 }
 0x4ae   : > { %v1459_v40 = vpop.f32.mrf.mxu1 }
 0x4af   : > { %v2463_v31 = vrot.slane %v1459_v40, 4 }
 0x4b2   : > { %v1419_v42 = vpop.f32.mrf.mxu3  ;;  %v1480_v46 = vpop.f32.mrf.mxu2 }
 0x4b3   : > { %v2465_v50 = vrot.slane %v1480_v46, 3 }
 0x4b4   : > { %v1438_v49 = vpop.f32.mrf.mxu0 }
 0x4b5   : > { %v2461_v38 = vrot.slane %v1438_v49, 5 }
 0x4b6   : > { %v1461_v23 = vpop.f32.mrf.mxu1 }
 0x4b7   : > { %v2462_v27 = vsel %vm607_vm5, %v2461_v38, %v2460_v35 }
 0x4b8   : > { %v2464_v43 = vsel %vm2437_vm8, %v2463_v31, %v2462_v27 }
 0x4b9   : > { %v2466_v53 = vsel %vm2440_vm9, %v2465_v50, %v2464_v43 }
 0x4ba   : > { %v1482_v30 = vpop.f32.mrf.mxu2  ;;  %v1501_v55 = vpop.f32.mrf.mxu3 }
 0x4bb   : > { %v2467_v13 = vrot.slane %v1501_v55, 2 }
 0x4bc   : > { %v1440_v22 = vpop.f32.mrf.mxu0 }
 0x4bd   : > { %v2468_v47 = vsel %vm2443_vm10, %v2467_v13, %v2466_v53  ;;  %v2000_v22 = vpop.permute.xlu0 %1999 }
 0x4be   : > { %v1545_v51 = vpop.f32.mrf.mxu1 }
 0x4bf   : > { %v1710_v56 = vsel %vm788_vm7, %v1545_v51, -inf }
 0x4c0   : > { %1711 = vmax.xlane.f32.xlu1 %v1710_v56 }
 0x4c2   : > { %v1503_v57 = vpop.f32.mrf.mxu3  ;;  %v1568_v33 = vpop.f32.mrf.mxu2 }
 0x4c3   : > { %v1713_v61 = vsel %vm788_vm7, %v1568_v33, -inf }
 0x4c4   : > { %1714 = vmax.xlane.f32.xlu2 %v1713_v61 }
 0x4c5   : > { %v3808_v57 = vpop.permute.xlu0 %2022 }
 0x4c6   : > { %v1547_v54 = vpop.f32.mrf.mxu1 }
 0x4ca   : > { %v1570_v0 = vpop.f32.mrf.mxu2  ;;  %v3779_v44 = vpop.f32.mrf.mxu3 }
 0x4cb   : > { %v1716_v1 = vsel %vm788_vm7, %v3779_v44, -inf }
 0x4cc   : > { %1717 = vmax.xlane.f32.xlu0 %v1716_v1 }
 0x4ce   : > { %v1637_v2 = vpop.f32.mrf.mxu1 }
 0x4cf   : > { %v1722_v63 = vsel %vm788_vm7, %v1637_v2, -inf }
 0x4d0   : > { %1723 = vmax.xlane.f32.xlu2 %v1722_v63 }
 0x4d2   : > { %v1593_v3 = vpop.f32.mrf.mxu3  ;;  %v3784_v60 = vpop.f32.mrf.mxu2 }
 0x4d3   : > { %v1725_v6 = vsel %vm788_vm7, %v3784_v60, -inf }
 0x4d4   : > { %1726 = vmax.xlane.f32.xlu0 %v1725_v6 }
 0x4d6   : > { %v1639_v8 = vpop.f32.mrf.mxu1 }
 0x4da   : > { %v1662_v9 = vpop.f32.mrf.mxu2  ;;  %v1683_v48 = vpop.f32.mrf.mxu3 }
 0x4db   : > { %v1728_v12 = vsel %vm788_vm7, %v1683_v48, -inf }
 0x4dc   : > { %1729 = vmax.xlane.f32.xlu1 %v1728_v12 }
 0x4e2   : > { %v1685_v5 = vpop.f32.mrf.mxu3 }
 0x4f5   : > { %v1522_v11 = vpop.f32.mrf.mxu0 }
 0x4f6   : > { %v2469_v14 = vrot.slane %v1522_v11, 1 }
 0x4f8   : > { %v3790_v17 = vsel %vm2446_vm11, %v2469_v14, %v2468_v47 }
 0x4fd   : > { %v1524_v19 = vpop.f32.mrf.mxu0 }
 0x505   : > { %v1614_v34 = vpop.f32.mrf.mxu0 }
 0x506   : > { %v1719_v37 = vsel %vm788_vm7, %v1614_v34, -inf }
 0x507   : > { %1720 = vmax.xlane.f32.xlu2 %v1719_v37 }
 0x50d   : > { %v1616_v25 = vpop.f32.mrf.mxu0 }
 0x515   : > { %v1706_v26 = vpop.f32.mrf.mxu0 }
 0x516   : > { %v1731_v59 = vsel %vm788_vm7, %v1706_v26, -inf }
 0x517   : > { %1732 = vmax.xlane.f32.xlu0 %v1731_v59 }
 0x51d   : > { %v1708_v10 = vpop.f32.mrf.mxu0 }
 0x52b   : > { %2045 = vrot.lane.b32.xlu0 %v3408_v52, %s3199_s23 }
 0x533   : > { %v1712_v39 = vpop.xlane.xlu1 %1711 }
 0x534   : > { %v1734_v16 = vsub.f32 %v1545_v51, %v1712_v39  ;;  %v2005_v39 = vsel %vm621_vm1, %v2000_v22, 0  ;;  %v2028_v22 = vsel %vm621_vm1, %v3808_v57, 0 }
 0x536   : > { %v1742_v35 = vmul.f32 1.442695, %v1734_v16 }
 0x537   : > { %v1715_v40 = vpop.xlane.xlu2 %1714 }
 0x538   : > { %3034 = vpow2.f32 %v1742_v35  ;;  %v1735_v42 = vsub.f32 %v1568_v33, %v1715_v40  ;;  %v3812_v33 = vpop.permute.xlu0 %2020 }
 0x53a   : > { %v1744_v46 = vmul.f32 1.442695, %v1735_v42 }
 0x53c   : > { %3036 = vpow2.f32 %v1744_v46 }
 0x53e   : > { %v3035_v49 = vpop.eup %3034 }
 0x53f   : > { %v1758_v38 = vsel %vm788_vm7, %v3035_v49, 0.0 }
 0x540   : > { %1759 = vadd.xlane.f32.xlu2 %v1758_v38  ;;  %v1977_v61 = vpop.permute.xlu0 %1976 }
 0x542   : > { %v3037_v31 = vpop.eup %3036 }
 0x543   : > { %v1724_v23 = vpop.xlane.xlu2 %1723  ;;  %v1761_v50 = vsel %vm788_vm7, %v3037_v31, 0.0 }
 0x544   : > { %v1738_v27 = vsub.f32 %v1637_v2, %v1724_v23  ;;  %1762 = vadd.xlane.f32.xlu1 %v1761_v50 }
 0x546   : > { %v1750_v43 = vmul.f32 1.442695, %v1738_v27 }
 0x548   : > { %3038 = vpow2.f32 %v1750_v43  ;;  %v1718_v54 = vpop.xlane.xlu0 %1717 }
 0x549   : > { %v1736_v2 = vsub.f32 %v3779_v44, %v1718_v54 }
 0x54b   : > { %v1746_v3 = vmul.f32 1.442695, %v1736_v2 }
 0x54e   : > { %v3800_v53 = vpop.eup %3038 }
 0x54f   : > { %v1730_v30 = vpop.xlane.xlu1 %1729  ;;  %v1770_v55 = vsel %vm788_vm7, %v3800_v53, 0.0 }
 0x550   : > { %v1740_v13 = vsub.f32 %v1683_v48, %v1730_v30  ;;  %1771 = vadd.xlane.f32.xlu2 %v1770_v55  ;;  %v1727_v6 = vpop.xlane.xlu0 %1726 }
 0x551   : > { %v1739_v25 = vsub.f32 %v3784_v60, %v1727_v6 }
 0x552   : > { %v1754_v47 = vmul.f32 1.442695, %v1740_v13 }
 0x553   : > { %v1752_v10 = vmul.f32 1.442695, %v1739_v25 }
 0x554   : > { %3040 = vpow2.f32 %v1754_v47 }
 0x55a   : > { %v3804_v51 = vpop.eup %3040 }
 0x55b   : > { %v1776_v56 = vsel %vm788_vm7, %v3804_v51, 0.0 }
 0x55c   : > { %1777 = vadd.xlane.f32.xlu0 %v1776_v56 }
 0x55d   : > { %2114 = vrot.lane.b32.xlu1 %v3448_v18, %s3199_s23 }
 0x570   : > { %1974 = vrot.lane.b32.xlu0 %v3379_v32, %s3199_s23 }
 0x578   : > { %2112 = vrot.lane.b32.xlu0 %v3455_v24, %s3199_s23 }
 0x57a   : > { %v1721_v0 = vpop.xlane.xlu2 %1720 }
 0x57b   : > { %v1737_v1 = vsub.f32 %v1614_v34, %v1721_v0 }
 0x57d   : > { %v1748_v63 = vmul.f32 1.442695, %v1737_v1 }
 0x57f   : > { %3042 = vpow2.f32 %v1748_v63 }
 0x580   : > { %2066 = vrot.lane.b32.xlu0 %v3430_v4, %s3199_s23  ;;  %3044 = vpow2.f32 %v1746_v3 }
 0x585   : > { %v3043_v8 = vpop.eup %3042 }
 0x586   : > { %v1767_v9 = vsel %vm788_vm7, %v3043_v8, 0.0  ;;  %v3045_v24 = vpop.eup %3044 }
 0x587   : > { %1768 = vadd.xlane.f32.xlu2 %v1767_v9  ;;  %v1764_v12 = vsel %vm788_vm7, %v3045_v24, 0.0 }
 0x588   : > { %2296 = vrot.lane.b32.xlu0 %v3398_v45, %s3200_s17 }
 0x58a   : > { %v1733_v32 = vpop.xlane.xlu0 %1732 }
 0x58b   : > { %v1741_v48 = vsub.f32 %v1706_v26, %v1733_v32  ;;  %v1982_v26 = vsel %vm621_vm1, %v1977_v61, 0 }
 0x58d   : > { %v1756_v44 = vmul.f32 1.442695, %v1741_v48 }
 0x58f   : > { %3046 = vpow2.f32 %v1756_v44  ;;  %1765 = vadd.xlane.f32.xlu2 %v1764_v12 }
 0x595   : > { %v3825_v4 = vpop.eup %3046 }
 0x596   : > { %v1779_v5 = vsel %vm788_vm7, %v3825_v4, 0.0 }
 0x597   : > { %1780 = vadd.xlane.f32.xlu1 %v1779_v5 }
 0x59d   : > { %v2046_v46 = vpop.permute.xlu0 %2045 }
 0x59e   : > { %v2051_v30 = vsel %vm621_vm1, %v2046_v46, 0 }
 0x5a7   : > { %2091 = vrot.lane.b32.xlu2 %v3435_v7, %s3199_s23 }
 0x5b0   : > { %2089 = vrot.lane.b32.xlu1 %v3443_v15, %s3199_s23 }
 0x5b3   : > { %v1760_v45 = vpop.xlane.xlu2 %1759 }
 0x5b4   : > { %3048 = vrcp.f32 %v1760_v45 }
 0x5b7   : > { %v1763_v11 = vpop.xlane.xlu1 %1762 }
 0x5b8   : > { %3050 = vrcp.f32 %v1763_v11  ;;  %2137 = vrot.lane.b32.xlu1 %v3495_v20, %s3199_s23 }
 0x5ba   : > { %v3049_v14 = vpop.eup %3048 }
 0x5bb   : > { %v1790_v19 = vmul.f32 %v3049_v14, %v3035_v49 }
 0x5bd   : > { %v1798_v34 = vpack.c.bf16 %v1790_v19, %v1790_v19 }
 0x5be   : > { %v3051_v37 = vpop.eup %3050 }
 0x5bf   : > { %v1791_v59 = vmul.f32 %v3051_v37, %v3037_v31  ;;  %2835 = vmatmul.msk.bf16.vlgmr.msrb.gmra.mxu1 %vm621_vm1, %v1798_v34 }
 0x5c0   : > { %1991 = vmatpush.bf16.xpose.msrb.mxu1 %v1982_v26  ;;  %2275 = vrot.lane.b32.xlu1 %v3384_v36, %s3200_s17 }
 0x5c1   : > { %v1799_v15 = vpack.c.bf16 %v1791_v59, %v1791_v59 }
 0x5c3   : > { %2836 = vmatmul.msk.bf16.vlgmr.msrb.gmra.mxu2 %vm621_vm1, %v1799_v15  ;;  %v1772_v16 = vpop.xlane.xlu2 %1771 }
 0x5c4   : > { %2014 = vmatpush.bf16.xpose.msrb.mxu2 %v2005_v39  ;;  %3052 = vrcp.f32 %v1772_v16 }
 0x5c5   : > { %3054 = vpow2.f32 %v1752_v10 }
 0x5ca   : > { %v3053_v60 = vpop.eup %3052 }
 0x5cb   : > { %v1794_v35 = vmul.f32 %v3053_v60, %v3800_v53  ;;  %v3843_v40 = vpop.eup %3054 }
 0x5cc   : > { %v1773_v36 = vsel %vm788_vm7, %v3843_v40, 0.0 }
 0x5cd   : > { %v1802_v42 = vpack.c.bf16 %v1794_v35, %v1794_v35 }
 0x5cf   : > { %2839 = vmatmul.msk.bf16.vlgmr.msra.gmra.mxu1 %vm621_vm1, %v1802_v42  ;;  %v1778_v49 = vpop.xlane.xlu0 %1777  ;;  %v2115_v50 = vpop.permute.xlu1 %2114 }
 0x5d0   : > { %1774 = vadd.xlane.f32.xlu2 %v1773_v36  ;;  %v2120_v2 = vsel %vm621_vm1, %v2115_v50, 0 }
 0x5e2   : > { %v1975_v38 = vpop.permute.xlu0 %1974 }
 0x5e3   : > { %2843 = vmatmul.msk.bf16.vlgmr.msrb.gmra.mxu1 %vm621_vm1, %v1975_v38 }
 0x5e8   : > { %2043 = vrot.lane.b32.xlu2 %v3420_v58, %s3199_s23 }
 0x5ea   : > { %v2113_v54 = vpop.permute.xlu0 %2112 }
 0x5f0   : > { %2068 = vrot.lane.b32.xlu2 %v3425_v62, %s3199_s23 }
 0x5f2   : > { %v2067_v57 = vpop.permute.xlu0 %2066 }
 0x5f8   : > { %2135 = vrot.lane.b32.xlu2 %v3461_v28, %s3199_s23 }
 0x5fa   : > { %v1769_v31 = vpop.xlane.xlu2 %1768  ;;  %v2297_v6 = vpop.permute.xlu0 %2296 }
 0x5fb   : > { %3056 = vrcp.f32 %v1769_v31  ;;  %v2302_v9 = vsel %vm893_vm6, %v2297_v6, 0 }
 0x600   : > { %2254 = vrot.lane.b32.xlu2 %v3366_v21, %s3200_s17 }
 0x601   : > { %v3057_v23 = vpop.eup %3056 }
 0x602   : > { %v1793_v27 = vmul.f32 %v3057_v23, %v3043_v8  ;;  %v1766_v43 = vpop.xlane.xlu2 %1765 }
 0x603   : > { %3058 = vrcp.f32 %v1766_v43 }
 0x604   : > { %v1801_v53 = vpack.c.bf16 %v1793_v27, %v1793_v27 }
 0x606   : > { %2838 = vmatmul.msk.bf16.vlgmr.msrb.gmra.mxu0 %vm621_vm1, %v1801_v53 }
 0x607   : > { %2060 = vmatpush.bf16.xpose.msrb.mxu0 %v2051_v30 }
 0x609   : > { %v3059_v58 = vpop.eup %3058 }
 0x60a   : > { %v1792_v55 = vmul.f32 %v3059_v58, %v3045_v24  ;;  %v1781_v13 = vpop.xlane.xlu1 %1780 }
 0x60b   : > { %3060 = vrcp.f32 %v1781_v13 }
 0x60c   : > { %v1800_v28 = vpack.c.bf16 %v1792_v55, %v1792_v55  ;;  %3062 = vrcp.f32 %v1778_v49 }
 0x60e   : > { %2837 = vmatmul.msk.bf16.vlgmr.msrb.gmra.mxu3 %vm621_vm1, %v1800_v28 }
 0x60f   : > { %2037 = vmatpush.bf16.xpose.msrb.mxu3 %v2028_v22 }
 0x611   : > { %v3061_v21 = vpop.eup %3060 }
 0x612   : > { %v1797_v47 = vmul.f32 %v3061_v21, %v3825_v4  ;;  %v3063_v61 = vpop.eup %3062 }
 0x613   : > { %v1796_v0 = vmul.f32 %v3063_v61, %v3804_v51  ;;  %v2092_v51 = vpop.permute.xlu2 %2091 }
 0x614   : > { %v1805_v56 = vpack.c.bf16 %v1797_v47, %v1797_v47  ;;  %v2097_v34 = vsel %vm621_vm1, %v2092_v51, 0 }
 0x615   : > { %v1804_v1 = vpack.c.bf16 %v1796_v0, %v1796_v0 }
 0x616   : > { %2842 = vmatmul.msk.bf16.vlgmr.msra.gmra.mxu0 %vm621_vm1, %v1805_v56 }
 0x61e   : > { %2841 = vmatmul.msk.bf16.vlgmr.msra.gmra.mxu3 %vm621_vm1, %v1804_v1 }
 0x61f   : > { %2129 = vmatpush.bf16.xpose.msra.mxu3 %v2120_v2 }
 0x622   : > { %v2090_v63 = vpop.permute.xlu1 %2089 }
 0x62a   : > { %v2138_v3 = vpop.permute.xlu1 %2137 }
 0x62b   : > { %v2143_v8 = vsel %vm621_vm1, %v2138_v3, 0 }
 0x62c   : > { %2152 = vmatpush.bf16.xpose.msra.mxu0 %v2143_v8 }
 0x62e   : > { %2845 = vmatmul.msk.bf16.vlgmr.msrb.gmra.mxu3 %vm621_vm1, %v3812_v33 }
 0x62f   : > { %2311 = vmatpush.bf16.msrb.mxu3 %v2302_v9 }
 0x632   : > { %v2276_v15 = vpop.permute.xlu1 %2275 }
 0x633   : > { %v2281_v10 = vsel %vm893_vm6, %v2276_v15, 0 }
 0x63c   : > { %v1823_v32 = vpop.f32.mrf.mxu1 }
 0x63e   : > { %2849 = vmatmul.msk.bf16.vlgmr.msra.gmra.mxu3 %vm621_vm1, %v2113_v54 }
 0x643   : > { %v1775_v24 = vpop.xlane.xlu2 %1774 }
 0x644   : > { %3064 = vrcp.f32 %v1775_v24  ;;  %v1825_v48 = vpop.f32.mrf.mxu1 }
 0x646   : > { %v1844_v44 = vpop.f32.mrf.mxu2 }
 0x647   : > { %v2482_v12 = vrot.slane %v1844_v44, 7 }
 0x649   : > { %v2483_v4 = vsel %vm599_vm3, %v2482_v12, %v1823_v32 }
 0x64a   : > { %v3065_v5 = vpop.eup %3064 }
 0x64b   : > { %v1795_v45 = vmul.f32 %v3065_v5, %v3843_v40  ;;  %v2044_v11 = vpop.permute.xlu2 %2043 }
 0x64c   : > { %v1907_v14 = vpop.f32.mrf.mxu1  ;;  %2846 = vmatmul.msk.bf16.vlgmr.msrb.gmra.mxu0 %vm621_vm1, %v2044_v11 }
 0x64d   : > { %v1803_v33 = vpack.c.bf16 %v1795_v45, %v1795_v45  ;;  %v2488_v23 = vrot.slane %v1907_v14, 4 }
 0x64e   : > { %v1846_v19 = vpop.f32.mrf.mxu2 }
 0x64f   : > { %2840 = vmatmul.msk.bf16.vlgmr.msra.gmra.mxu2 %vm621_vm1, %v1803_v33 }
 0x650   : > { %2106 = vmatpush.bf16.xpose.msra.mxu2 %v2097_v34 }
 0x653   : > { %v2069_v37 = vpop.permute.xlu2 %2068 }
 0x654   : > { %v2074_v25 = vsel %vm621_vm1, %v2069_v37, 0  ;;  %v1909_v26 = vpop.f32.mrf.mxu1 }
 0x655   : > { %2083 = vmatpush.bf16.xpose.msra.mxu1 %v2074_v25 }
 0x65b   : > { %v2136_v59 = vpop.permute.xlu2 %2135 }
 0x65c   : > { %2847 = vmatmul.msk.bf16.vlgmr.msra.gmra.mxu1 %vm621_vm1, %v2067_v57  ;;  %2850 = vmatmul.msk.bf16.vlgmr.msra.gmra.mxu0 %vm621_vm1, %v2136_v59 }
 0x65f   : > { %2844 = vmatmul.msk.bf16.vlgmr.msrb.gmra.mxu2 %vm621_vm1, %v3794_v29 }
 0x660   : > { %2290 = vmatpush.bf16.msrb.mxu2 %v2281_v10  ;;  %v1993_v39 = vpop.f32.mrf.mxu1 }
 0x661   : > { %v2158_v16 = vsel %vm788_vm7, %v1993_v39, -inf }
 0x662   : > { %2159 = vmax.xlane.f32.xlu2 %v2158_v16 }
 0x663   : > { %v2255_v60 = vpop.permute.xlu2 %2254 }
 0x664   : > { %v2260_v35 = vsel %vm893_vm6, %v2255_v60, 0 }
 0x665   : > { %2269 = vmatpush.bf16.msrb.mxu1 %v2260_v35 }
 0x668   : > { %v1995_v40 = vpop.f32.mrf.mxu1 }
 0x66f   : > { %2848 = vmatmul.msk.bf16.vlgmr.msra.gmra.mxu2 %vm621_vm1, %v2090_v63 }
 0x683   : > { %v1886_v42 = vpop.f32.mrf.mxu0 }
 0x684   : > { %v2486_v38 = vrot.slane %v1886_v42, 5 }
 0x68b   : > { %v1888_v36 = vpop.f32.mrf.mxu0 }
 0x691   : > { %v1865_v46 = vpop.f32.mrf.mxu3 }
 0x692   : > { %v2484_v49 = vrot.slane %v1865_v46, 6 }
 0x693   : > { %v1970_v31 = vpop.f32.mrf.mxu0 }
 0x694   : > { %v2485_v29 = vsel %vm603_vm4, %v2484_v49, %v2483_v4  ;;  %v2494_v2 = vrot.slane %v1970_v31, 1 }
 0x695   : > { %v2487_v50 = vsel %vm607_vm5, %v2486_v38, %v2485_v29 }
 0x696   : > { %v2489_v27 = vsel %vm2437_vm8, %v2488_v23, %v2487_v50 }
 0x699   : > { %v1867_v43 = vpop.f32.mrf.mxu3 }
 0x69b   : > { %v1972_v53 = vpop.f32.mrf.mxu0 }
 0x6a1   : > { %v1949_v30 = vpop.f32.mrf.mxu3 }
 0x6a2   : > { %v2492_v1 = vrot.slane %v1949_v30, 2 }
 0x6a9   : > { %v1951_v58 = vpop.f32.mrf.mxu3 }
 0x6b1   : > { %v2039_v55 = vpop.f32.mrf.mxu3 }
 0x6b2   : > { %v2164_v13 = vsel %vm788_vm7, %v2039_v55, -inf }
 0x6b3   : > { %2165 = vmax.xlane.f32.xlu0 %v2164_v13 }
 0x6b9   : > { %v2041_v28 = vpop.f32.mrf.mxu3 }
 0x6c1   : > { %v3890_v22 = vpop.f32.mrf.mxu3 }
 0x6c2   : > { %v2176_v21 = vsel %vm788_vm7, %v3890_v22, -inf }
 0x6c3   : > { %2177 = vmax.xlane.f32.xlu2 %v2176_v21 }
 0x6c9   : > { %v2062_v47 = vpop.f32.mrf.mxu0  ;;  %v2133_v56 = vpop.f32.mrf.mxu3 }
 0x6ca   : > { %v2167_v4 = vsel %vm788_vm7, %v2062_v47, -inf }
 0x6d1   : > { %v2064_v61 = vpop.f32.mrf.mxu0 }
 0x6d2   : > { %v1928_v54 = vpop.f32.mrf.mxu2 }
 0x6d3   : > { %v2490_v0 = vrot.slane %v1928_v54, 3 }
 0x6d5   : > { %v2491_v57 = vsel %vm2440_vm9, %v2490_v0, %v2489_v27  ;;  %v2160_v5 = vpop.xlane.xlu2 %2159 }
 0x6d6   : > { %v2493_v63 = vsel %vm2443_vm10, %v2492_v1, %v2491_v57  ;;  %v2182_v45 = vsub.f32 %v1993_v39, %v2160_v5 }
 0x6d7   : > { %v3897_v3 = vsel %vm2446_vm11, %v2494_v2, %v2493_v63 }
 0x6d8   : > { %v2190_v33 = vmul.f32 1.442695, %v2182_v45 }
 0x6d9   : > { %v2085_v6 = vpop.f32.mrf.mxu1  ;;  %v3899_v8 = vpop.f32.mrf.mxu0 }
 0x6da   : > { %v1930_v9 = vpop.f32.mrf.mxu2  ;;  %v2170_v51 = vsel %vm788_vm7, %v2085_v6, -inf  ;;  %3066 = vpow2.f32 %v2190_v33  ;;  %v2179_v19 = vsel %vm788_vm7, %v3899_v8, -inf }
 0x6db   : > { %2359 = vrot.lane.b32.xlu2 %v3435_v7, %s3200_s17  ;;  %2171 = vmax.xlane.f32.xlu1 %v2170_v51 }
 0x6e0   : > { %v3909_v34 = vpop.eup %3066 }
 0x6e1   : > { %v2087_v32 = vpop.f32.mrf.mxu1  ;;  %v2156_v24 = vpop.f32.mrf.mxu0  ;;  %v2206_v37 = vsel %vm788_vm7, %v3909_v34, 0.0 }
 0x6e2   : > { %v2016_v48 = vpop.f32.mrf.mxu2 }
 0x6e3   : > { %v2161_v44 = vsel %vm788_vm7, %v2016_v48, -inf }
 0x6e4   : > { %2162 = vmax.xlane.f32.xlu1 %v2161_v44 }
 0x6ea   : > { %v2018_v12 = vpop.f32.mrf.mxu2 }
 0x6ec   : > { %2168 = vmax.xlane.f32.xlu1 %v2167_v4 }
 0x6f2   : > { %v2108_v11 = vpop.f32.mrf.mxu2 }
 0x6f3   : > { %v2173_v14 = vsel %vm788_vm7, %v2108_v11, -inf }
 0x6f4   : > { %2174 = vmax.xlane.f32.xlu0 %v2173_v14 }
 0x6fa   : > { %v2110_v7 = vpop.f32.mrf.mxu2 }
 0x6fc   : > { %2180 = vmax.xlane.f32.xlu0 %v2179_v19 }
 0x704   : > { %2207 = vadd.xlane.f32.xlu0 %v2206_v37 }
 0x705   : > { %2317 = vrot.lane.b32.xlu1 %v3408_v52, %s3200_s17 }
 0x726   : > { %v2166_v15 = vpop.xlane.xlu0 %2165 }
 0x727   : > { %v2184_v16 = vsub.f32 %v2039_v55, %v2166_v15 }
 0x729   : > { %v2194_v35 = vmul.f32 1.442695, %v2184_v16 }
 0x736   : > { %v2178_v25 = vpop.xlane.xlu2 %2177 }
 0x737   : > { %v2188_v29 = vsub.f32 %v3890_v22, %v2178_v25 }
 0x739   : > { %v2202_v53 = vmul.f32 1.442695, %v2188_v29 }
 0x73e   : > { %v2360_v26 = vpop.permute.xlu2 %2359 }
 0x73f   : > { %v2365_v59 = vsel %vm893_vm6, %v2360_v26, 0 }
 0x740   : > { %2374 = vmatpush.bf16.msra.mxu2 %v2365_v59 }
 0x74e   : > { %v2172_v10 = vpop.xlane.xlu1 %2171 }
 0x74f   : > { %v2186_v39 = vsub.f32 %v2085_v6, %v2172_v10 }
 0x751   : > { %v2198_v60 = vmul.f32 1.442695, %v2186_v39 }
 0x753   : > { %3068 = vpow2.f32 %v2198_v60 }
 0x754   : > { %3070 = vpow2.f32 %v2194_v35 }
 0x757   : > { %v2163_v40 = vpop.xlane.xlu1 %2162 }
 0x758   : > { %v2183_v42 = vsub.f32 %v2016_v48, %v2163_v40 }
 0x759   : > { %v3916_v36 = vpop.eup %3068 }
 0x75a   : > { %v2192_v46 = vmul.f32 1.442695, %v2183_v42  ;;  %v2218_v52 = vsel %vm788_vm7, %v3916_v36, 0.0  ;;  %v3071_v49 = vpop.eup %3070 }
 0x75b   : > { %2219 = vadd.xlane.f32.xlu1 %v2218_v52  ;;  %v2212_v27 = vsel %vm788_vm7, %v3071_v49, 0.0 }
 0x75c   : > { %3072 = vpow2.f32 %v2192_v46 }
 0x75f   : > { %v2169_v38 = vpop.xlane.xlu1 %2168 }
 0x760   : > { %v2185_v31 = vsub.f32 %v2062_v47, %v2169_v38 }
 0x762   : > { %v3073_v23 = vpop.eup %3072  ;;  %v2196_v50 = vmul.f32 1.442695, %v2185_v31 }
 0x763   : > { %2213 = vadd.xlane.f32.xlu1 %v2212_v27  ;;  %v2209_v43 = vsel %vm788_vm7, %v3073_v23, 0.0 }
 0x764   : > { %3074 = vpow2.f32 %v2196_v50  ;;  %2210 = vadd.xlane.f32.xlu2 %v2209_v43 }
 0x765   : > { %3076 = vpow2.f32 %v2202_v53 }
 0x767   : > { %v2175_v30 = vpop.xlane.xlu0 %2174 }
 0x768   : > { %v2187_v58 = vsub.f32 %v2108_v11, %v2175_v30  ;;  %v2885_v30 = vld [vmem:[%s449_s11 + $0x8] sm:$0xff] }
 0x76a   : > { %v3075_v55 = vpop.eup %3074  ;;  %v2200_v13 = vmul.f32 1.442695, %v2187_v58 }
 0x76b   : > { %v2215_v28 = vsel %vm788_vm7, %v3075_v55, 0.0  ;;  %v3924_v22 = vpop.eup %3076 }
 0x76c   : > { %3078 = vpow2.f32 %v2200_v13  ;;  %2216 = vadd.xlane.f32.xlu2 %v2215_v28  ;;  %v2224_v54 = vsel %vm788_vm7, %v3924_v22, 0.0 }
 0x76f   : > { %v2181_v21 = vpop.xlane.xlu0 %2180 }
 0x770   : > { %v2189_v47 = vsub.f32 %v3899_v8, %v2181_v21 }
 0x772   : > { %v3079_v56 = vpop.eup %3078  ;;  %v2204_v61 = vmul.f32 1.442695, %v2189_v47 }
 0x773   : > { %v2221_v0 = vsel %vm788_vm7, %v3079_v56, 0.0 }
 0x774   : > { %3080 = vpow2.f32 %v2204_v61  ;;  %2225 = vadd.xlane.f32.xlu2 %v2224_v54  ;;  %2222 = vadd.xlane.f32.xlu0 %v2221_v0 }
 0x777   : > { %v2318_v1 = vpop.permute.xlu1 %2317  ;;  %v2208_v2 = vpop.xlane.xlu0 %2207 }
 0x778   : > { %v2323_v57 = vsel %vm893_vm6, %v2318_v1, 0  ;;  %3082 = vrcp.f32 %v2208_v2 }
 0x779   : > { %2332 = vmatpush.bf16.msrb.mxu0 %v2323_v57 }
 0x77a   : > { %v3081_v63 = vpop.eup %3080 }
 0x77b   : > { %v2227_v6 = vsel %vm788_vm7, %v3081_v63, 0.0 }
 0x77c   : > { %2338 = vrot.lane.b32.xlu1 %v3425_v62, %s3200_s17  ;;  %2228 = vadd.xlane.f32.xlu0 %v2227_v6 }
 0x77e   : > { %v3083_v8 = vpop.eup %3082 }
 0x77f   : > { %v2238_v9 = vmul.f32 %v3083_v8, %v3909_v34 }
 0x781   : > { %v2246_v51 = vpack.c.bf16 %v2238_v9, %v2238_v9 }
 0x783   : > { %2851 = vmatmul.msk.bf16.vlgmr.msrb.gmra.mxu1 %vm621_vm1, %v2246_v51 }
 0x784   : > { %2496 = vrot.lane.b32.xlu1 %v3897_v3, %s3201_s13  ;;  %s2580_s13 = scalar_lea.hbm %s4030_s8, %s2870_s16 }
 0x785   : > { %s2584_s10 = sshll.u32 %s2580_s13, 4  ;;  %s2585_s10 = int_to_ptr.hbm [resolvable:$true] %s2584_s10 }
 0x786   : > { %s3112_s9 = sshra.s32 %s2585_s10, 4  ;;  %s3113_s9 = int_to_ptr.hbm [resolvable:$true] %s3112_s9 }
 0x787   : > { %p3119_p5 = scmp.lt.s32.totalorder %s3113_s9, %s4030_s8 }
 0x78c   : > { %2401 = vrot.lane.b32.xlu2 %v3495_v20, %s3200_s17 }
 0x790   : > { %2380 = vrot.lane.b32.xlu0 %v3448_v18, %s3200_s17 }
 0x798   : > { %2471 = vrot.lane.b32.xlu0 %v3790_v17, %s3202_s14 }
 0x7ce   : > { %v2220_v62 = vpop.xlane.xlu1 %2219 }
 0x7d6   : > { %v2214_v32 = vpop.xlane.xlu1 %2213 }
 0x7d7   : > { %3084 = vrcp.f32 %v2214_v32  ;;  %v2211_v24 = vpop.xlane.xlu2 %2210 }
 0x7d8   : > { %3086 = vrcp.f32 %v2211_v24  ;;  %v2884_v24 = vld [vmem:[%s449_s11] sm:$0xff]  ;;  %s3114_s11 = scalar_lea.hbm %s3113_s9, 8 }
 0x7d9   : > { %p3115_p1 = scmp.ne.s32.totalorder %s3113_s9, %s3114_s11 }
 0x7db   : > { %p3116_p2 = pnand %p3115_p1, %p3300_p3 }
 0x7dd   : > { %v3085_v48 = vpop.eup %3084  ;;  %p3117_p4 = pneg %p3116_p2 }
 0x7de   : > { %v3087_v44 = vpop.eup %3086  ;;  %v2240_v12 = vmul.f32 %v3085_v48, %v3071_v49 }
 0x7df   : > { %v2239_v4 = vmul.f32 %v3087_v44, %v3073_v23  ;;  %v2217_v5 = vpop.xlane.xlu2 %2216 }
 0x7e0   : > { %v2248_v3 = vpack.c.bf16 %v2240_v12, %v2240_v12  ;;  %3088 = vrcp.f32 %v2217_v5 }
 0x7e1   : > { %v2247_v45 = vpack.c.bf16 %v2239_v4, %v2239_v4  ;;  %3090 = vrcp.f32 %v2220_v62 }
 0x7e2   : > { %2853 = vmatmul.msk.bf16.vlgmr.msrb.gmra.mxu3 %vm621_vm1, %v2248_v3 }
 0x7e3   : > { %2852 = vmatmul.msk.bf16.vlgmr.msrb.gmra.mxu2 %vm621_vm1, %v2247_v45 }
 0x7e6   : > { %v3089_v18 = vpop.eup %3088 }
 0x7e7   : > { %v2241_v20 = vmul.f32 %v3089_v18, %v3075_v55  ;;  %v2226_v17 = vpop.xlane.xlu2 %2225  ;;  %v2223_v11 = vpop.xlane.xlu0 %2222 }
 0x7e8   : > { %3092 = vrcp.f32 %v2223_v11  ;;  %v3091_v33 = vpop.eup %3090 }
 0x7e9   : > { %v2249_v14 = vpack.c.bf16 %v2241_v20, %v2241_v20  ;;  %v2242_v7 = vmul.f32 %v3091_v33, %v3916_v36 }
 0x7eb   : > { %2854 = vmatmul.msk.bf16.vlgmr.msrb.gmra.mxu0 %vm621_vm1, %v2249_v14  ;;  %v2250_v10 = vpack.c.bf16 %v2242_v7, %v2242_v7 }
 0x7ee   : > { %v2339_v19 = vpop.permute.xlu1 %2338  ;;  %v3093_v34 = vpop.eup %3092 }
 0x7ef   : > { %v2344_v37 = vsel %vm893_vm6, %v2339_v19, 0  ;;  %v2402_v25 = vpop.permute.xlu2 %2401  ;;  %v2229_v26 = vpop.xlane.xlu0 %2228  ;;  %v2243_v59 = vmul.f32 %v3093_v34, %v3079_v56 }
 0x7f0   : > { %v2407_v15 = vsel %vm893_vm6, %v2402_v25, 0  ;;  %3094 = vrcp.f32 %v2229_v26  ;;  %2353 = vmatpush.bf16.msra.mxu1 %v2344_v37 }
 0x7f1   : > { %2416 = vmatpush.bf16.msra.mxu0 %v2407_v15  ;;  %v2251_v39 = vpack.c.bf16 %v2243_v59, %v2243_v59  ;;  %3096 = vrcp.f32 %v2226_v17 }
 0x7f3   : > { %2855 = vmatmul.msk.bf16.vlgmr.msra.gmra.mxu1 %vm621_vm1, %v2250_v10  ;;  %2856 = vmatmul.msk.bf16.vlgmr.msra.gmra.mxu2 %vm621_vm1, %v2251_v39 }
 0x7f4   : > { %2559 = vmatpush.bf16.msrb.mxu1 %v2885_v30 }
 0x7f6   : > { %v3095_v16 = vpop.eup %3094  ;;  %v2497_v12 = vpop.permute.xlu1 %2496 }
 0x7f7   : > { %v2245_v60 = vmul.f32 %v3095_v16, %v3081_v63  ;;  %v3097_v40 = vpop.eup %3096 }
 0x7f8   : > { %v2244_v36 = vmul.f32 %v3097_v40, %v3924_v22  ;;  %2560 = vmatpush.bf16.msrb.mxu1 %v2884_v24 }
 0x7f9   : > { %v2253_v35 = vpack.c.bf16 %v2245_v60, %v2245_v60 }
 0x7fa   : > { %v2252_v49 = vpack.c.bf16 %v2244_v36, %v2244_v36 }
 0x7fb   : > { %2858 = vmatmul.msk.bf16.vlgmr.msra.gmra.mxu0 %vm621_vm1, %v2253_v35 }
 0x800   : > { %v2271_v42 = vpop.f32.mrf.mxu1 }
 0x802   : > { %v2381_v46 = vpop.permute.xlu0 %2380 }
 0x803   : > { %v2386_v52 = vsel %vm893_vm6, %v2381_v46, 0 }
 0x804   : > { %2395 = vmatpush.bf16.msra.mxu3 %v2386_v52 }
 0x807   : > { %2857 = vmatmul.msk.bf16.vlgmr.msra.gmra.mxu3 %vm621_vm1, %v2252_v49 }
 0x808   : > { %v2273_v38 = vpop.f32.mrf.mxu1 }
 0x80a   : > { %v2472_v48 = vpop.permute.xlu0 %2471 }
 0x80b   : > { %v2524_v44 = vsel %vm621_vm1, %v3627_v41, %v2472_v48  ;;  %v2969_v41 = vld [vmem:[%s452_s20] ss:$0 sm:$0xff]  ;;  %s3118_s20 = scalar_lea.hbm %s4030_s8, 32 }
 0x80c   : > { %v2526_v4 = vsel %vm2525_vm12, %v2524_v44, %v2497_v12  ;;  %p3120_p6 = scmp.lt.s32.totalorder %s3118_s20, %s3114_s11 }
 0x80e   : > { %p3121_p7 = por %p3120_p6, %p3119_p5 }
 0x810   : > { %p3122_p9 = pnand %p3121_p7, %p3117_p4 }
 0x865   : > { %v2313_v31 = vpop.f32.mrf.mxu3 }
 0x866   : > { %v2292_v23 = vpop.f32.mrf.mxu2  ;;  %v2509_v56 = vrot.slane %v2313_v31, 6 }
 0x867   : > { %v2507_v21 = vrot.slane %v2292_v23, 7 }
 0x868   : > { %v2334_v29 = vpop.f32.mrf.mxu0 }
 0x869   : > { %v2508_v47 = vsel %vm599_vm3, %v2507_v21, %v2271_v42  ;;  %v2511_v61 = vrot.slane %v2334_v29, 5 }
 0x86a   : > { %v2510_v54 = vsel %vm603_vm4, %v2509_v56, %v2508_v47 }
 0x86b   : > { %v2512_v2 = vsel %vm607_vm5, %v2511_v61, %v2510_v54 }
 0x86d   : > { %v2315_v50 = vpop.f32.mrf.mxu3 }
 0x86e   : > { %v2294_v27 = vpop.f32.mrf.mxu2 }
 0x870   : > { %v2336_v43 = vpop.f32.mrf.mxu0  ;;  %v2355_v53 = vpop.f32.mrf.mxu1 }
 0x871   : > { %v2513_v0 = vrot.slane %v2355_v53, 4 }
 0x873   : > { %v2514_v63 = vsel %vm2437_vm8, %v2513_v0, %v2512_v2 }
 0x876   : > { %v2376_v58 = vpop.f32.mrf.mxu2 }
 0x877   : > { %v2515_v1 = vrot.slane %v2376_v58, 3 }
 0x878   : > { %v2357_v55 = vpop.f32.mrf.mxu1  ;;  %v2418_v13 = vpop.f32.mrf.mxu0 }
 0x879   : > { %v2516_v8 = vsel %vm2440_vm9, %v2515_v1, %v2514_v63  ;;  %v2519_v9 = vrot.slane %v2418_v13, 1 }
 0x87e   : > { %v2378_v28 = vpop.f32.mrf.mxu2 }
 0x880   : > { %v2420_v22 = vpop.f32.mrf.mxu0 }
 0x88a   : > { %v2397_v57 = vpop.f32.mrf.mxu3 }
 0x88b   : > { %v2517_v6 = vrot.slane %v2397_v57, 2 }
 0x88d   : > { %v2518_v51 = vsel %vm2443_vm10, %v2517_v6, %v2516_v8 }
 0x88e   : > { %v2520_v62 = vsel %vm2446_vm11, %v2519_v9, %v2518_v51 }
 0x88f   : > { %2521 = vrot.lane.b32.xlu2 %v2520_v62, %s3203_s26 }
 0x892   : > { %v2399_v32 = vpop.f32.mrf.mxu3 }
 0x8e9   : > { %v2522_v5 = vpop.permute.xlu2 %2521 }
 0x8ea   : > { %v2528_v3 = vsel %vm2527_vm13, %v2526_v4, %v2522_v5 }
 0x8eb   : > { %v2529_v45 = vpack.c.bf16 %v2528_v3, %v2528_v3 }
 0x8ed   : > { %2867 = vmatmul.msk.bf16.vlgmr.msrb.gmra.mxu1 %vm502_vm0, %v2529_v45 }
 0x96a   : > { %v2562_v18 = vpop.f32.mrf.mxu1 }
 0x96b   : > { %v2563_v20 = vadd.f32 %v2969_v41, %v2562_v18 }
 0x96d   : > { %2566 = vst.msk [vmem:[%s414_s21] sm:$0xff] %vm502_vm0, %v2563_v20 }
 0x96e   : > { %3125 = shalt.err (!%p3122_p9)
}
 0x96f   : > { %2886 = dma.vmem_to_hbm [thread:$0]  (%p3300_p3), %s2583_s22, 128, %s2585_s10, %s2568_s30  }
 0x972   : > { %v2564_v17 = vpop.f32.mrf.mxu1 }
 0x973 PF: > { %p2892_p10 = scmp.ge.s32.totalorder %s3192_s12, 2  ;;  %s2596_s16 = sand.u32 1, %s3164_s27  }
 0x974   : > { %s2597_s19 = scalar_lea.sflag [#allocation3], %s2596_s16 }
 0x975   : > { %p2889_p11 = pnand %p2892_p10, %p3309_p8 }
 0x977   : > { %p2890_p12 = pneg %p2889_p11 }
 0x979   : > { %3159 = dma.done.wait (%p2890_p12), %s2597_s19, 128  }
 0x97a   : > { %3161 = vsyncadd (%p2890_p12), %s2597_s19, 4294967168  ;;  %s21_s12 = sadd.s32 1, %s3192_s12   ;;  %s4049_s23 = sld [smem:[#allocation5_spill]] }
 0x97b   : > { %p18_p13 = scmp.ge.s32.totalorder %s21_s12, 6   ;;  %s4050_s29 = sld [smem:[#allocation11_spill]] }
 0x97c   : > { %s4051_s30 = sld [smem:[#allocation6_spill]]  ;;  %s4055_s27 = smov %s3168_s28 }
 0x97d   : > { %s4052_s9 = sld [smem:[#allocation7_spill]]  ;;  %20 = sbr.rel (!%p18_p13) target bundleno = 7 (0x7), region = 108 }
 0x97e   : > { %s4053_s10 = sld [smem:[#allocation8_spill]] }
 0x97f   : > { %s4054_s11 = sld [smem:[#allocation9_spill]] }
 0x980   : > { %s4056_s28 = smov %s4049_s23 }
 0x982   :  { %2603 = vsyncpa [#allocation3], 1 }
 0x983   :  { %2605 = vsyncpa [#allocation3 + $0x1], 1 }

</bundles_post_ra>
